<compile_context>
chip_gen: v7x
topology: tpu7x:2x2x1
jax: 0.10.0
libtpu: 0.0.40
codegen_flags: <defaults>
</compile_context>

<pallas_src>
import functools
import math

import jax
import jax.numpy as jnp
from jax.experimental import pallas as pl
from jax.experimental.pallas import tpu as pltpu

# ----------------------------- model hyper-params (small synthetic) -----------------------------
CIN = 3          # input image channels
PATCH = 8        # synthetic backbone downsample factor (ResNet stride stand-in)
CBACK = 64       # synthetic backbone output channels (stand-in for 2048)
DMODEL = 32      # hidden_dim (stand-in for 256)
NHEADS = 4       # nheads (stand-in for 8)
DFF = 64         # dim_feedforward (stand-in for 2048)
NLAYERS = 2      # enc_layers (stand-in for 6)
LN_EPS = 1e-5    # torch.nn.LayerNorm default


# ----------------------------------------- Pallas kernels ---------------------------------------
def _ln(x, g, b):
    # LayerNorm over the last dim; g, b are (1, D) and broadcast over rows.
    mu = jnp.mean(x, axis=-1, keepdims=True)
    var = jnp.mean((x - mu) ** 2, axis=-1, keepdims=True)
    return (x - mu) * jax.lax.rsqrt(var + LN_EPS) * g + b


def _backbone_proj_kernel(p_ref, cw_ref, cb_ref, pw_ref, pb_ref, o_ref):
    # Fused: synthetic strided patch conv (im2col matmul + ReLU) then input_proj 1x1 conv.
    feat = jnp.dot(p_ref[...], cw_ref[...], preferred_element_type=jnp.float32) + cb_ref[...]
    feat = jnp.maximum(feat, 0.0)
    o_ref[...] = (jnp.dot(feat, pw_ref[...], preferred_element_type=jnp.float32)
                  + pb_ref[...]).astype(o_ref.dtype)


def pallas_backbone_proj(patches, conv_w, conv_b, proj_w, proj_b):
    M = patches.shape[0]
    return pl.pallas_call(
        _backbone_proj_kernel,
        out_shape=jax.ShapeDtypeStruct((M, DMODEL), jnp.float32),
    )(patches, conv_w, conv_b.reshape(1, -1), proj_w, proj_b.reshape(1, -1))


def _layernorm_kernel(x_ref, g_ref, b_ref, o_ref):
    o_ref[...] = _ln(x_ref[...].astype(jnp.float32), g_ref[...], b_ref[...]).astype(o_ref.dtype)


def pallas_layernorm(x, gamma, beta):
    M, D = x.shape
    return pl.pallas_call(
        _layernorm_kernel,
        out_shape=jax.ShapeDtypeStruct((M, D), jnp.float32),
    )(x, gamma.reshape(1, D), beta.reshape(1, D))


def _encoder_layer_kernel(src_ref, pos_ref,
                          ln1g_ref, ln1b_ref, wqk_ref, bqk_ref, wv_ref, bv_ref,
                          wo_ref, bo_ref, ln2g_ref, ln2b_ref,
                          w1_ref, b1_ref, w2_ref, b2_ref,
                          out_ref, *, nheads, scale):
    # One grid step = one batch element.  Everything for this batch stays in VMEM/vregs.
    src = src_ref[0].astype(jnp.float32)          # (S, D)
    pos = pos_ref[0].astype(jnp.float32)          # (S, D)
    S, D = src.shape
    Dh = D // nheads

    # ---- pre-LN 1 + fused Q/K projection (q = k = LN(src) + pos) and V projection ----
    src2 = _ln(src, ln1g_ref[...], ln1b_ref[...])
    qk_in = src2 + pos
    qk = jnp.dot(qk_in, wqk_ref[...], preferred_element_type=jnp.float32) + bqk_ref[...]  # (S, 2D)
    v = jnp.dot(src2, wv_ref[...], preferred_element_type=jnp.float32) + bv_ref[...]      # (S, D)
    q = qk[:, :D]
    k = qk[:, D:]

    # ---- per-head attention; key padding mask is statically all-False -> no mask bias ----
    # output projection accumulated per head: attn @ Wo == sum_h attn_h @ Wo[h*Dh:(h+1)*Dh, :]
    attn_proj = jnp.zeros((S, D), jnp.float32)
    for h in range(nheads):
        lo, hi = h * Dh, (h + 1) * Dh
        qh = q[:, lo:hi]
        kh = k[:, lo:hi]
        vh = v[:, lo:hi]
        s = jax.lax.dot_general(qh, kh, (((1,), (1,)), ((), ())),
                                preferred_element_type=jnp.float32) * scale   # (S, S)
        m = jnp.max(s, axis=-1, keepdims=True)
        p = jnp.exp(s - m)
        l = jnp.sum(p, axis=-1, keepdims=True)
        p = p * pl.reciprocal(l, approx=True)
        oh = jnp.dot(p, vh, preferred_element_type=jnp.float32)               # (S, Dh)
        attn_proj = attn_proj + jnp.dot(oh, wo_ref[lo:hi, :],
                                        preferred_element_type=jnp.float32)   # (S, D)

    # ---- residual after out-projection ----
    src = src + attn_proj + bo_ref[...]

    # ---- pre-LN 2 + FFN (ReLU) + residual ----
    src2 = _ln(src, ln2g_ref[...], ln2b_ref[...])
    hdn = jnp.maximum(
        jnp.dot(src2, w1_ref[...], preferred_element_type=jnp.float32) + b1_ref[...], 0.0)
    ffn = jnp.dot(hdn, w2_ref[...], preferred_element_type=jnp.float32) + b2_ref[...]
    out_ref[0] = (src + ffn).astype(out_ref.dtype)


def pallas_encoder_layer(src, pos, p):
    B, S, D = src.shape
    scale = 1.0 / math.sqrt(D // NHEADS)

    seq_spec = pl.BlockSpec((1, S, D), lambda b: (b, 0, 0))

    def full2d(a):
        return pl.BlockSpec(a.shape, lambda b: (0, 0))

    def row(v):
        return v.reshape(1, -1)

    args = (src, pos,
            row(p["ln1_g"]), row(p["ln1_b"]),
            p["wqk"], row(p["bqk"]), p["wv"], row(p["bv"]),
            p["wo"], row(p["bo"]),
            row(p["ln2_g"]), row(p["ln2_b"]),
            p["w1"], row(p["b1"]), p["w2"], row(p["b2"]))
    in_specs = [seq_spec, seq_spec] + [full2d(a) for a in args[2:]]

    return pl.pallas_call(
        functools.partial(_encoder_layer_kernel, nheads=NHEADS, scale=scale),
        out_shape=jax.ShapeDtypeStruct((B, S, D), jnp.float32),
        grid=(B,),
        in_specs=in_specs,
        out_specs=seq_spec,
        compiler_params=pltpu.CompilerParams(dimension_semantics=("parallel",)),
    )(*args)


# ----------------------------------------- model glue -------------------------------------------
def sine_position_embedding(mask, d_model):
    # DETR PositionEmbeddingSine(num_pos_feats=d/2, temperature=10000, normalize=True)
    B, H, W = mask.shape
    npf = d_model // 2
    not_mask = (~mask).astype(jnp.float32)
    y_embed = jnp.cumsum(not_mask, axis=1)
    x_embed = jnp.cumsum(not_mask, axis=2)
    eps = 1e-6
    scale = 2.0 * math.pi
    y_embed = y_embed / (y_embed[:, -1:, :] + eps) * scale
    x_embed = x_embed / (x_embed[:, :, -1:] + eps) * scale
    dim_t = jnp.arange(npf, dtype=jnp.float32)
    dim_t = 10000.0 ** (2.0 * (dim_t // 2) / npf)
    pos_x = x_embed[..., None] / dim_t
    pos_y = y_embed[..., None] / dim_t
    pos_x = jnp.stack((jnp.sin(pos_x[..., 0::2]), jnp.cos(pos_x[..., 1::2])),
                      axis=4).reshape(B, H, W, -1)
    pos_y = jnp.stack((jnp.sin(pos_y[..., 0::2]), jnp.cos(pos_y[..., 1::2])),
                      axis=4).reshape(B, H, W, -1)
    return jnp.concatenate((pos_y, pos_x), axis=3)   # (B, H, W, d_model)


def catr_backbone_forward(x, params):
    # x: (B, 3, H, W) float32, NCHW like PyTorch.
    B, C, H, W = x.shape
    Hf, Wf = H // PATCH, W // PATCH
    S = Hf * Wf

    # im2col for the synthetic strided patch conv (XLA glue).
    # TODO(synk): at real image sizes fold this strided copy into the conv kernel's input DMA.
    patches = x.reshape(B, C, Hf, PATCH, Wf, PATCH)
    patches = patches.transpose(0, 2, 4, 1, 3, 5).reshape(B * S, C * PATCH * PATCH)

    # fused synthetic backbone conv (+ReLU) and input_proj (1x1 conv == per-pixel linear)
    proj = pallas_backbone_proj(patches, params["conv_w"], params["conv_b"],
                                params["proj_w"], params["proj_b"])
    proj = proj.reshape(B, S, DMODEL)

    # Equal-sized images -> nested_tensor padding mask is statically all-False; it is only
    # needed to compute the sine positional embedding (the attention mask path is dropped).
    mask = jnp.zeros((B, Hf, Wf), dtype=bool)
    pos = sine_position_embedding(mask, DMODEL).reshape(B, S, DMODEL)

    # transformer encoder (pre-norm, CATR config): one fused pallas_call per layer
    src = proj
    for lp in params["layers"]:
        src = pallas_encoder_layer(src, pos, lp)

    # final LayerNorm (normalize_before=True encoder has a terminal norm)
    mem = pallas_layernorm(src.reshape(B * S, DMODEL), params["lnf_g"], params["lnf_b"])
    # (B, S, D) -> (S, B, D), matching PyTorch's flatten(2).permute(2, 0, 1) convention
    return mem.reshape(B, S, DMODEL).transpose(1, 0, 2)


# ----------------------------------------- parameter init ---------------------------------------
def init_params(key):
    keys = iter(jax.random.split(key, 32))

    def dense(fan_in, fan_out):
        return jax.random.normal(next(keys), (fan_in, fan_out), jnp.float32) / jnp.sqrt(fan_in)

    params = {
        "conv_w": dense(CIN * PATCH * PATCH, CBACK),
        "conv_b": jnp.zeros((CBACK,), jnp.float32),
        "proj_w": dense(CBACK, DMODEL),
        "proj_b": jnp.zeros((DMODEL,), jnp.float32),
        "lnf_g": jnp.ones((DMODEL,), jnp.float32),
        "lnf_b": jnp.zeros((DMODEL,), jnp.float32),
        "layers": [],
    }
    for _ in range(NLAYERS):
        lp = {
            # q and k projections stored pre-fused along the output dim: (D, 2D)
            "wqk": dense(DMODEL, 2 * DMODEL), "bqk": jnp.zeros((2 * DMODEL,), jnp.float32),
            "wv": dense(DMODEL, DMODEL), "bv": jnp.zeros((DMODEL,), jnp.float32),
            "wo": dense(DMODEL, DMODEL), "bo": jnp.zeros((DMODEL,), jnp.float32),
            "w1": dense(DMODEL, DFF), "b1": jnp.zeros((DFF,), jnp.float32),
            "w2": dense(DFF, DMODEL), "b2": jnp.zeros((DMODEL,), jnp.float32),
            "ln1_g": jnp.ones((DMODEL,), jnp.float32), "ln1_b": jnp.zeros((DMODEL,), jnp.float32),
            "ln2_g": jnp.ones((DMODEL,), jnp.float32), "ln2_b": jnp.zeros((DMODEL,), jnp.float32),
        }
        params["layers"].append(lp)
    return params


# -------------------------------------------- main -----------------------------------------------
if __name__ == "__main__":
    key = jax.random.PRNGKey(0)
    pkey, xkey = jax.random.split(key)
    params = init_params(pkey)

    # batch=2, channels=3, spatial=32 -> feature map 4x4 -> seq len 16, hidden 32
    x = jax.random.normal(xkey, (2, CIN, 32, 32), jnp.float32)

    memory = jax.jit(catr_backbone_forward)(x, params)
    memory = jax.block_until_ready(memory)
    assert memory.shape == (16, 2, DMODEL), memory.shape
    assert bool(jnp.all(jnp.isfinite(memory)))
    print("KERNEL_OK")
</pallas_src>

<mosaic_0001>
module attributes {stable_mosaic.version = 11 : i64} {
  func.func @_backbone_proj_kernel(%arg0: memref<32x192xf32, #tpu.memory_space<vmem>>, %arg1: memref<192x64xf32, #tpu.memory_space<vmem>>, %arg2: memref<1x64xf32, #tpu.memory_space<vmem>>, %arg3: memref<64x32xf32, #tpu.memory_space<vmem>>, %arg4: memref<1x32xf32, #tpu.memory_space<vmem>>, %arg5: memref<32x32xf32, #tpu.memory_space<vmem>>) attributes {dimension_semantics = [], scalar_prefetch = 0 : i64, scratch_operands = 0 : i64, tpu.core_type = #tpu.core_type<tc>} {
    %c0 = arith.constant 0 : index
    %c0_0 = arith.constant 0 : index
    %0 = vector.load %arg0[%c0, %c0_0] : memref<32x192xf32, #tpu.memory_space<vmem>>, vector<32x192xf32>
    %c0_1 = arith.constant 0 : index
    %c0_2 = arith.constant 0 : index
    %1 = vector.load %arg1[%c0_1, %c0_2] : memref<192x64xf32, #tpu.memory_space<vmem>>, vector<192x64xf32>
    %cst = arith.constant dense<0.000000e+00> : vector<32x64xf32>
    %2 = tpu.matmul %0, %1, %cst {dimension_numbers = #tpu.dot_dimension_numbers<[1], [0], [0], [1], [0, 0, 1, 1], [], []>} : vector<32x192xf32>, vector<192x64xf32>, vector<32x64xf32> -> vector<32x64xf32>
    %c0_3 = arith.constant 0 : index
    %c0_4 = arith.constant 0 : index
    %3 = vector.load %arg2[%c0_3, %c0_4] : memref<1x64xf32, #tpu.memory_space<vmem>>, vector<1x64xf32>
    %4 = vector.broadcast %3 : vector<1x64xf32> to vector<32x64xf32>
    %5 = arith.addf %2, %4 : vector<32x64xf32>
    %cst_5 = arith.constant 0.000000e+00 : f32
    %6 = vector.broadcast %cst_5 : f32 to vector<32x64xf32>
    %7 = arith.maximumf %5, %6 : vector<32x64xf32>
    %c0_6 = arith.constant 0 : index
    %c0_7 = arith.constant 0 : index
    %8 = vector.load %arg3[%c0_6, %c0_7] : memref<64x32xf32, #tpu.memory_space<vmem>>, vector<64x32xf32>
    %cst_8 = arith.constant dense<0.000000e+00> : vector<32x32xf32>
    %9 = tpu.matmul %7, %8, %cst_8 {dimension_numbers = #tpu.dot_dimension_numbers<[1], [0], [0], [1], [0, 0, 1, 1], [], []>} : vector<32x64xf32>, vector<64x32xf32>, vector<32x32xf32> -> vector<32x32xf32>
    %c0_9 = arith.constant 0 : index
    %c0_10 = arith.constant 0 : index
    %10 = vector.load %arg4[%c0_9, %c0_10] : memref<1x32xf32, #tpu.memory_space<vmem>>, vector<1x32xf32>
    %11 = vector.broadcast %10 : vector<1x32xf32> to vector<32x32xf32>
    %12 = arith.addf %9, %11 : vector<32x32xf32>
    %c0_11 = arith.constant 0 : index
    %c0_12 = arith.constant 0 : index
    %13 = vector.load %arg5[%c0_11, %c0_12] : memref<32x32xf32, #tpu.memory_space<vmem>>, vector<32x32xf32>
    tpu.vector_store %arg5[%c0_11, %c0_12], %12 {strides = array<i32>} : memref<32x32xf32, #tpu.memory_space<vmem>>, vector<32x32xf32>,
    return
  }
}

module attributes {stable_mosaic.version = 11 : i64} {
  func.func @_layernorm_kernel(%arg0: memref<32x32xf32, #tpu.memory_space<vmem>>, %arg1: memref<1x32xf32, #tpu.memory_space<vmem>>, %arg2: memref<1x32xf32, #tpu.memory_space<vmem>>, %arg3: memref<32x32xf32, #tpu.memory_space<vmem>>) attributes {dimension_semantics = [], scalar_prefetch = 0 : i64, scratch_operands = 0 : i64, tpu.core_type = #tpu.core_type<tc>} {
    %c0 = arith.constant 0 : index
    %c0_0 = arith.constant 0 : index
    %0 = vector.load %arg0[%c0, %c0_0] : memref<32x32xf32, #tpu.memory_space<vmem>>, vector<32x32xf32>
    %c0_1 = arith.constant 0 : index
    %c0_2 = arith.constant 0 : index
    %1 = vector.load %arg1[%c0_1, %c0_2] : memref<1x32xf32, #tpu.memory_space<vmem>>, vector<1x32xf32>
    %c0_3 = arith.constant 0 : index
    %c0_4 = arith.constant 0 : index
    %2 = vector.load %arg2[%c0_3, %c0_4] : memref<1x32xf32, #tpu.memory_space<vmem>>, vector<1x32xf32>
    %cst = arith.constant dense<0.000000e+00> : vector<32xf32>
    %3 = vector.multi_reduction <add>, %0, %cst [1] : vector<32x32xf32> to vector<32xf32>
    %4 = vector.shape_cast %3 : vector<32xf32> to vector<32x1xf32>
    %cst_5 = arith.constant 3.200000e+01 : f32
    %5 = vector.broadcast %cst_5 : f32 to vector<32x1xf32>
    %6 = arith.divf %4, %5 : vector<32x1xf32>
    %7 = vector.broadcast %6 : vector<32x1xf32> to vector<32x32xf32>
    %8 = arith.subf %0, %7 : vector<32x32xf32>
    %9 = arith.mulf %8, %8 : vector<32x32xf32>
    %cst_6 = arith.constant dense<0.000000e+00> : vector<32xf32>
    %10 = vector.multi_reduction <add>, %9, %cst_6 [1] : vector<32x32xf32> to vector<32xf32>
    %11 = vector.shape_cast %10 : vector<32xf32> to vector<32x1xf32>
    %cst_7 = arith.constant 3.200000e+01 : f32
    %12 = vector.broadcast %cst_7 : f32 to vector<32x1xf32>
    %13 = arith.divf %11, %12 : vector<32x1xf32>
    %14 = vector.broadcast %6 : vector<32x1xf32> to vector<32x32xf32>
    %15 = arith.subf %0, %14 : vector<32x32xf32>
    %cst_8 = arith.constant 9.99999974E-6 : f32
    %16 = vector.broadcast %cst_8 : f32 to vector<32x1xf32>
    %17 = arith.addf %13, %16 : vector<32x1xf32>
    %18 = math.rsqrt %17 : vector<32x1xf32>
    %19 = vector.broadcast %18 : vector<32x1xf32> to vector<32x32xf32>
    %20 = arith.mulf %15, %19 : vector<32x32xf32>
    %21 = vector.broadcast %1 : vector<1x32xf32> to vector<32x32xf32>
    %22 = arith.mulf %20, %21 : vector<32x32xf32>
    %23 = vector.broadcast %2 : vector<1x32xf32> to vector<32x32xf32>
    %24 = arith.addf %22, %23 : vector<32x32xf32>
    %c0_9 = arith.constant 0 : index
    %c0_10 = arith.constant 0 : index
    %25 = vector.load %arg3[%c0_9, %c0_10] : memref<32x32xf32, #tpu.memory_space<vmem>>, vector<32x32xf32>
    tpu.vector_store %arg3[%c0_9, %c0_10], %24 {strides = array<i32>} : memref<32x32xf32, #tpu.memory_space<vmem>>, vector<32x32xf32>,
    return
  }
}

module attributes {stable_mosaic.version = 11 : i64} {
  func.func @_encoder_layer_kernel(%arg0: i32, %arg1: memref<1x16x32xf32, #tpu.memory_space<vmem>>, %arg2: memref<1x16x32xf32, #tpu.memory_space<vmem>>, %arg3: memref<1x32xf32, #tpu.memory_space<vmem>>, %arg4: memref<1x32xf32, #tpu.memory_space<vmem>>, %arg5: memref<32x64xf32, #tpu.memory_space<vmem>>, %arg6: memref<1x64xf32, #tpu.memory_space<vmem>>, %arg7: memref<32x32xf32, #tpu.memory_space<vmem>>, %arg8: memref<1x32xf32, #tpu.memory_space<vmem>>, %arg9: memref<32x32xf32, #tpu.memory_space<vmem>>, %arg10: memref<1x32xf32, #tpu.memory_space<vmem>>, %arg11: memref<1x32xf32, #tpu.memory_space<vmem>>, %arg12: memref<1x32xf32, #tpu.memory_space<vmem>>, %arg13: memref<32x64xf32, #tpu.memory_space<vmem>>, %arg14: memref<1x64xf32, #tpu.memory_space<vmem>>, %arg15: memref<64x32xf32, #tpu.memory_space<vmem>>, %arg16: memref<1x32xf32, #tpu.memory_space<vmem>>, %arg17: memref<1x16x32xf32, #tpu.memory_space<vmem>>) attributes {dimension_semantics = [#tpu.dimension_semantics<parallel>], iteration_bounds = array<i64: 2>, scalar_prefetch = 0 : i64, scratch_operands = 0 : i64, tpu.core_type = #tpu.core_type<tc>, window_params = [{transform_indices = @transform_0, window_bounds = array<i64: 1, 16, 32>}, {transform_indices = @transform_1, window_bounds = array<i64: 1, 16, 32>}, {pipeline_mode = #tpu.pipeline_mode<synchronous>, transform_indices = @transform_2, window_bounds = array<i64: 1, 32>}, {pipeline_mode = #tpu.pipeline_mode<synchronous>, transform_indices = @transform_3, window_bounds = array<i64: 1, 32>}, {pipeline_mode = #tpu.pipeline_mode<synchronous>, transform_indices = @transform_4, window_bounds = array<i64: 32, 64>}, {pipeline_mode = #tpu.pipeline_mode<synchronous>, transform_indices = @transform_5, window_bounds = array<i64: 1, 64>}, {pipeline_mode = #tpu.pipeline_mode<synchronous>, transform_indices = @transform_6, window_bounds = array<i64: 32, 32>}, {pipeline_mode = #tpu.pipeline_mode<synchronous>, transform_indices = @transform_7, window_bounds = array<i64: 1, 32>}, {pipeline_mode = #tpu.pipeline_mode<synchronous>, transform_indices = @transform_8, window_bounds = array<i64: 32, 32>}, {pipeline_mode = #tpu.pipeline_mode<synchronous>, transform_indices = @transform_9, window_bounds = array<i64: 1, 32>}, {pipeline_mode = #tpu.pipeline_mode<synchronous>, transform_indices = @transform_10, window_bounds = array<i64: 1, 32>}, {pipeline_mode = #tpu.pipeline_mode<synchronous>, transform_indices = @transform_11, window_bounds = array<i64: 1, 32>}, {pipeline_mode = #tpu.pipeline_mode<synchronous>, transform_indices = @transform_12, window_bounds = array<i64: 32, 64>}, {pipeline_mode = #tpu.pipeline_mode<synchronous>, transform_indices = @transform_13, window_bounds = array<i64: 1, 64>}, {pipeline_mode = #tpu.pipeline_mode<synchronous>, transform_indices = @transform_14, window_bounds = array<i64: 64, 32>}, {pipeline_mode = #tpu.pipeline_mode<synchronous>, transform_indices = @transform_15, window_bounds = array<i64: 1, 32>}, {transform_indices = @transform_16, window_bounds = array<i64: 1, 16, 32>}]} {
    %c0 = arith.constant 0 : index
    %c0_0 = arith.constant 0 : index
    %c0_1 = arith.constant 0 : index
    %0 = vector.load %arg1[%c0, %c0_0, %c0_1] : memref<1x16x32xf32, #tpu.memory_space<vmem>>, vector<1x16x32xf32>
    %1 = vector.shape_cast %0 : vector<1x16x32xf32> to vector<16x32xf32>
    %c0_2 = arith.constant 0 : index
    %c0_3 = arith.constant 0 : index
    %c0_4 = arith.constant 0 : index
    %2 = vector.load %arg2[%c0_2, %c0_3, %c0_4] : memref<1x16x32xf32, #tpu.memory_space<vmem>>, vector<1x16x32xf32>
    %3 = vector.shape_cast %2 : vector<1x16x32xf32> to vector<16x32xf32>
    %c0_5 = arith.constant 0 : index
    %c0_6 = arith.constant 0 : index
    %4 = vector.load %arg3[%c0_5, %c0_6] : memref<1x32xf32, #tpu.memory_space<vmem>>, vector<1x32xf32>
    %c0_7 = arith.constant 0 : index
    %c0_8 = arith.constant 0 : index
    %5 = vector.load %arg4[%c0_7, %c0_8] : memref<1x32xf32, #tpu.memory_space<vmem>>, vector<1x32xf32>
    %cst = arith.constant dense<0.000000e+00> : vector<16xf32>
    %6 = vector.multi_reduction <add>, %1, %cst [1] : vector<16x32xf32> to vector<16xf32>
    %7 = vector.shape_cast %6 : vector<16xf32> to vector<16x1xf32>
    %cst_9 = arith.constant 3.200000e+01 : f32
    %8 = vector.broadcast %cst_9 : f32 to vector<16x1xf32>
    %9 = arith.divf %7, %8 : vector<16x1xf32>
    %10 = vector.broadcast %9 : vector<16x1xf32> to vector<16x32xf32>
    %11 = arith.subf %1, %10 : vector<16x32xf32>
    %12 = arith.mulf %11, %11 : vector<16x32xf32>
    %cst_10 = arith.constant dense<0.000000e+00> : vector<16xf32>
    %13 = vector.multi_reduction <add>, %12, %cst_10 [1] : vector<16x32xf32> to vector<16xf32>
    %14 = vector.shape_cast %13 : vector<16xf32> to vector<16x1xf32>
    %cst_11 = arith.constant 3.200000e+01 : f32
    %15 = vector.broadcast %cst_11 : f32 to vector<16x1xf32>
    %16 = arith.divf %14, %15 : vector<16x1xf32>
    %17 = vector.broadcast %9 : vector<16x1xf32> to vector<16x32xf32>
    %18 = arith.subf %1, %17 : vector<16x32xf32>
    %cst_12 = arith.constant 9.99999974E-6 : f32
    %19 = vector.broadcast %cst_12 : f32 to vector<16x1xf32>
    %20 = arith.addf %16, %19 : vector<16x1xf32>
    %21 = math.rsqrt %20 : vector<16x1xf32>
    %22 = vector.broadcast %21 : vector<16x1xf32> to vector<16x32xf32>
    %23 = arith.mulf %18, %22 : vector<16x32xf32>
    %24 = vector.broadcast %4 : vector<1x32xf32> to vector<16x32xf32>
    %25 = arith.mulf %23, %24 : vector<16x32xf32>
    %26 = vector.broadcast %5 : vector<1x32xf32> to vector<16x32xf32>
    %27 = arith.addf %25, %26 : vector<16x32xf32>
    %28 = arith.addf %27, %3 : vector<16x32xf32>
    %c0_13 = arith.constant 0 : index
    %c0_14 = arith.constant 0 : index
    %29 = vector.load %arg5[%c0_13, %c0_14] : memref<32x64xf32, #tpu.memory_space<vmem>>, vector<32x64xf32>
    %cst_15 = arith.constant dense<0.000000e+00> : vector<16x64xf32>
    %30 = tpu.matmul %28, %29, %cst_15 {dimension_numbers = #tpu.dot_dimension_numbers<[1], [0], [0], [1], [0, 0, 1, 1], [], []>} : vector<16x32xf32>, vector<32x64xf32>, vector<16x64xf32> -> vector<16x64xf32>
    %c0_16 = arith.constant 0 : index
    %c0_17 = arith.constant 0 : index
    %31 = vector.load %arg6[%c0_16, %c0_17] : memref<1x64xf32, #tpu.memory_space<vmem>>, vector<1x64xf32>
    %32 = vector.broadcast %31 : vector<1x64xf32> to vector<16x64xf32>
    %33 = arith.addf %30, %32 : vector<16x64xf32>
    %c0_18 = arith.constant 0 : index
    %c0_19 = arith.constant 0 : index
    %34 = vector.load %arg7[%c0_18, %c0_19] : memref<32x32xf32, #tpu.memory_space<vmem>>, vector<32x32xf32>
    %cst_20 = arith.constant dense<0.000000e+00> : vector<16x32xf32>
    %35 = tpu.matmul %27, %34, %cst_20 {dimension_numbers = #tpu.dot_dimension_numbers<[1], [0], [0], [1], [0, 0, 1, 1], [], []>} : vector<16x32xf32>, vector<32x32xf32>, vector<16x32xf32> -> vector<16x32xf32>
    %c0_21 = arith.constant 0 : index
    %c0_22 = arith.constant 0 : index
    %36 = vector.load %arg8[%c0_21, %c0_22] : memref<1x32xf32, #tpu.memory_space<vmem>>, vector<1x32xf32>
    %37 = vector.broadcast %36 : vector<1x32xf32> to vector<16x32xf32>
    %38 = arith.addf %35, %37 : vector<16x32xf32>
    %39 = vector.extract_strided_slice %33 {offsets = [0, 0], sizes = [16, 32], strides = [1, 1]} : vector<16x64xf32> to vector<16x32xf32>
    %40 = vector.extract_strided_slice %33 {offsets = [0, 32], sizes = [16, 32], strides = [1, 1]} : vector<16x64xf32> to vector<16x32xf32>
    %cst_23 = arith.constant 0.000000e+00 : f32
    %41 = vector.broadcast %cst_23 : f32 to vector<16x32xf32>
    %42 = vector.extract_strided_slice %39 {offsets = [0, 0], sizes = [16, 8], strides = [1, 1]} : vector<16x32xf32> to vector<16x8xf32>
    %43 = vector.extract_strided_slice %40 {offsets = [0, 0], sizes = [16, 8], strides = [1, 1]} : vector<16x32xf32> to vector<16x8xf32>
    %44 = vector.extract_strided_slice %38 {offsets = [0, 0], sizes = [16, 8], strides = [1, 1]} : vector<16x32xf32> to vector<16x8xf32>
    %cst_24 = arith.constant dense<0.000000e+00> : vector<16x16xf32>
    %45 = tpu.matmul %42, %43, %cst_24 {dimension_numbers = #tpu.dot_dimension_numbers<[1], [1], [0], [0], [0, 0, 1, 0], [], []>} : vector<16x8xf32>, vector<16x8xf32>, vector<16x16xf32> -> vector<16x16xf32>
    %cst_25 = arith.constant 0.353553385 : f32
    %46 = vector.broadcast %cst_25 : f32 to vector<16x16xf32>
    %47 = arith.mulf %45, %46 : vector<16x16xf32>
    %cst_26 = arith.constant dense<0xFF800000> : vector<16xf32>
    %48 = vector.multi_reduction <maximumf>, %47, %cst_26 [1] : vector<16x16xf32> to vector<16xf32>
    %49 = vector.shape_cast %48 : vector<16xf32> to vector<16x1xf32>
    %50 = vector.broadcast %49 : vector<16x1xf32> to vector<16x16xf32>
    %51 = arith.subf %47, %50 : vector<16x16xf32>
    %52 = math.exp %51 : vector<16x16xf32>
    %cst_27 = arith.constant dense<0.000000e+00> : vector<16xf32>
    %53 = vector.multi_reduction <add>, %52, %cst_27 [1] : vector<16x16xf32> to vector<16xf32>
    %54 = vector.shape_cast %53 : vector<16xf32> to vector<16x1xf32>
    %55 = tpu.reciprocal %54 {approx = true} : vector<16x1xf32> -> vector<16x1xf32>
    %56 = vector.broadcast %55 : vector<16x1xf32> to vector<16x16xf32>
    %57 = arith.mulf %52, %56 : vector<16x16xf32>
    %cst_28 = arith.constant dense<0.000000e+00> : vector<16x8xf32>
    %58 = tpu.matmul %57, %44, %cst_28 {dimension_numbers = #tpu.dot_dimension_numbers<[1], [0], [0], [1], [0, 0, 1, 1], [], []>} : vector<16x16xf32>, vector<16x8xf32>, vector<16x8xf32> -> vector<16x8xf32>
    %c0_29 = arith.constant 0 : index
    %c0_30 = arith.constant 0 : index
    %59 = vector.load %arg9[%c0_29, %c0_30] : memref<32x32xf32, #tpu.memory_space<vmem>>, vector<8x32xf32>
    %cst_31 = arith.constant dense<0.000000e+00> : vector<16x32xf32>
    %60 = tpu.matmul %58, %59, %cst_31 {dimension_numbers = #tpu.dot_dimension_numbers<[1], [0], [0], [1], [0, 0, 1, 1], [], []>} : vector<16x8xf32>, vector<8x32xf32>, vector<16x32xf32> -> vector<16x32xf32>
    %61 = arith.addf %41, %60 : vector<16x32xf32>
    %62 = vector.extract_strided_slice %39 {offsets = [0, 8], sizes = [16, 8], strides = [1, 1]} : vector<16x32xf32> to vector<16x8xf32>
    %63 = vector.extract_strided_slice %40 {offsets = [0, 8], sizes = [16, 8], strides = [1, 1]} : vector<16x32xf32> to vector<16x8xf32>
    %64 = vector.extract_strided_slice %38 {offsets = [0, 8], sizes = [16, 8], strides = [1, 1]} : vector<16x32xf32> to vector<16x8xf32>
    %cst_32 = arith.constant dense<0.000000e+00> : vector<16x16xf32>
    %65 = tpu.matmul %62, %63, %cst_32 {dimension_numbers = #tpu.dot_dimension_numbers<[1], [1], [0], [0], [0, 0, 1, 0], [], []>} : vector<16x8xf32>, vector<16x8xf32>, vector<16x16xf32> -> vector<16x16xf32>
    %cst_33 = arith.constant 0.353553385 : f32
    %66 = vector.broadcast %cst_33 : f32 to vector<16x16xf32>
    %67 = arith.mulf %65, %66 : vector<16x16xf32>
    %cst_34 = arith.constant dense<0xFF800000> : vector<16xf32>
    %68 = vector.multi_reduction <maximumf>, %67, %cst_34 [1] : vector<16x16xf32> to vector<16xf32>
    %69 = vector.shape_cast %68 : vector<16xf32> to vector<16x1xf32>
    %70 = vector.broadcast %69 : vector<16x1xf32> to vector<16x16xf32>
    %71 = arith.subf %67, %70 : vector<16x16xf32>
    %72 = math.exp %71 : vector<16x16xf32>
    %cst_35 = arith.constant dense<0.000000e+00> : vector<16xf32>
    %73 = vector.multi_reduction <add>, %72, %cst_35 [1] : vector<16x16xf32> to vector<16xf32>
    %74 = vector.shape_cast %73 : vector<16xf32> to vector<16x1xf32>
    %75 = tpu.reciprocal %74 {approx = true} : vector<16x1xf32> -> vector<16x1xf32>
    %76 = vector.broadcast %75 : vector<16x1xf32> to vector<16x16xf32>
    %77 = arith.mulf %72, %76 : vector<16x16xf32>
    %cst_36 = arith.constant dense<0.000000e+00> : vector<16x8xf32>
    %78 = tpu.matmul %77, %64, %cst_36 {dimension_numbers = #tpu.dot_dimension_numbers<[1], [0], [0], [1], [0, 0, 1, 1], [], []>} : vector<16x16xf32>, vector<16x8xf32>, vector<16x8xf32> -> vector<16x8xf32>
    %c8 = arith.constant 8 : index
    %c0_37 = arith.constant 0 : index
    %79 = vector.load %arg9[%c8, %c0_37] : memref<32x32xf32, #tpu.memory_space<vmem>>, vector<8x32xf32>
    %cst_38 = arith.constant dense<0.000000e+00> : vector<16x32xf32>
    %80 = tpu.matmul %78, %79, %cst_38 {dimension_numbers = #tpu.dot_dimension_numbers<[1], [0], [0], [1], [0, 0, 1, 1], [], []>} : vector<16x8xf32>, vector<8x32xf32>, vector<16x32xf32> -> vector<16x32xf32>
    %81 = arith.addf %61, %80 : vector<16x32xf32>
    %82 = vector.extract_strided_slice %39 {offsets = [0, 16], sizes = [16, 8], strides = [1, 1]} : vector<16x32xf32> to vector<16x8xf32>
    %83 = vector.extract_strided_slice %40 {offsets = [0, 16], sizes = [16, 8], strides = [1, 1]} : vector<16x32xf32> to vector<16x8xf32>
    %84 = vector.extract_strided_slice %38 {offsets = [0, 16], sizes = [16, 8], strides = [1, 1]} : vector<16x32xf32> to vector<16x8xf32>
    %cst_39 = arith.constant dense<0.000000e+00> : vector<16x16xf32>
    %85 = tpu.matmul %82, %83, %cst_39 {dimension_numbers = #tpu.dot_dimension_numbers<[1], [1], [0], [0], [0, 0, 1, 0], [], []>} : vector<16x8xf32>, vector<16x8xf32>, vector<16x16xf32> -> vector<16x16xf32>
    %cst_40 = arith.constant 0.353553385 : f32
    %86 = vector.broadcast %cst_40 : f32 to vector<16x16xf32>
    %87 = arith.mulf %85, %86 : vector<16x16xf32>
    %cst_41 = arith.constant dense<0xFF800000> : vector<16xf32>
    %88 = vector.multi_reduction <maximumf>, %87, %cst_41 [1] : vector<16x16xf32> to vector<16xf32>
    %89 = vector.shape_cast %88 : vector<16xf32> to vector<16x1xf32>
    %90 = vector.broadcast %89 : vector<16x1xf32> to vector<16x16xf32>
    %91 = arith.subf %87, %90 : vector<16x16xf32>
    %92 = math.exp %91 : vector<16x16xf32>
    %cst_42 = arith.constant dense<0.000000e+00> : vector<16xf32>
    %93 = vector.multi_reduction <add>, %92, %cst_42 [1] : vector<16x16xf32> to vector<16xf32>
    %94 = vector.shape_cast %93 : vector<16xf32> to vector<16x1xf32>
    %95 = tpu.reciprocal %94 {approx = true} : vector<16x1xf32> -> vector<16x1xf32>
    %96 = vector.broadcast %95 : vector<16x1xf32> to vector<16x16xf32>
    %97 = arith.mulf %92, %96 : vector<16x16xf32>
    %cst_43 = arith.constant dense<0.000000e+00> : vector<16x8xf32>
    %98 = tpu.matmul %97, %84, %cst_43 {dimension_numbers = #tpu.dot_dimension_numbers<[1], [0], [0], [1], [0, 0, 1, 1], [], []>} : vector<16x16xf32>, vector<16x8xf32>, vector<16x8xf32> -> vector<16x8xf32>
    %c16 = arith.constant 16 : index
    %c0_44 = arith.constant 0 : index
    %99 = vector.load %arg9[%c16, %c0_44] : memref<32x32xf32, #tpu.memory_space<vmem>>, vector<8x32xf32>
    %cst_45 = arith.constant dense<0.000000e+00> : vector<16x32xf32>
    %100 = tpu.matmul %98, %99, %cst_45 {dimension_numbers = #tpu.dot_dimension_numbers<[1], [0], [0], [1], [0, 0, 1, 1], [], []>} : vector<16x8xf32>, vector<8x32xf32>, vector<16x32xf32> -> vector<16x32xf32>
    %101 = arith.addf %81, %100 : vector<16x32xf32>
    %102 = vector.extract_strided_slice %39 {offsets = [0, 24], sizes = [16, 8], strides = [1, 1]} : vector<16x32xf32> to vector<16x8xf32>
    %103 = vector.extract_strided_slice %40 {offsets = [0, 24], sizes = [16, 8], strides = [1, 1]} : vector<16x32xf32> to vector<16x8xf32>
    %104 = vector.extract_strided_slice %38 {offsets = [0, 24], sizes = [16, 8], strides = [1, 1]} : vector<16x32xf32> to vector<16x8xf32>
    %cst_46 = arith.constant dense<0.000000e+00> : vector<16x16xf32>
    %105 = tpu.matmul %102, %103, %cst_46 {dimension_numbers = #tpu.dot_dimension_numbers<[1], [1], [0], [0], [0, 0, 1, 0], [], []>} : vector<16x8xf32>, vector<16x8xf32>, vector<16x16xf32> -> vector<16x16xf32>
    %cst_47 = arith.constant 0.353553385 : f32
    %106 = vector.broadcast %cst_47 : f32 to vector<16x16xf32>
    %107 = arith.mulf %105, %106 : vector<16x16xf32>
    %cst_48 = arith.constant dense<0xFF800000> : vector<16xf32>
    %108 = vector.multi_reduction <maximumf>, %107, %cst_48 [1] : vector<16x16xf32> to vector<16xf32>
    %109 = vector.shape_cast %108 : vector<16xf32> to vector<16x1xf32>
    %110 = vector.broadcast %109 : vector<16x1xf32> to vector<16x16xf32>
    %111 = arith.subf %107, %110 : vector<16x16xf32>
    %112 = math.exp %111 : vector<16x16xf32>
    %cst_49 = arith.constant dense<0.000000e+00> : vector<16xf32>
    %113 = vector.multi_reduction <add>, %112, %cst_49 [1] : vector<16x16xf32> to vector<16xf32>
    %114 = vector.shape_cast %113 : vector<16xf32> to vector<16x1xf32>
    %115 = tpu.reciprocal %114 {approx = true} : vector<16x1xf32> -> vector<16x1xf32>
    %116 = vector.broadcast %115 : vector<16x1xf32> to vector<16x16xf32>
    %117 = arith.mulf %112, %116 : vector<16x16xf32>
    %cst_50 = arith.constant dense<0.000000e+00> : vector<16x8xf32>
    %118 = tpu.matmul %117, %104, %cst_50 {dimension_numbers = #tpu.dot_dimension_numbers<[1], [0], [0], [1], [0, 0, 1, 1], [], []>} : vector<16x16xf32>, vector<16x8xf32>, vector<16x8xf32> -> vector<16x8xf32>
    %c24 = arith.constant 24 : index
    %c0_51 = arith.constant 0 : index
    %119 = vector.load %arg9[%c24, %c0_51] : memref<32x32xf32, #tpu.memory_space<vmem>>, vector<8x32xf32>
    %cst_52 = arith.constant dense<0.000000e+00> : vector<16x32xf32>
    %120 = tpu.matmul %118, %119, %cst_52 {dimension_numbers = #tpu.dot_dimension_numbers<[1], [0], [0], [1], [0, 0, 1, 1], [], []>} : vector<16x8xf32>, vector<8x32xf32>, vector<16x32xf32> -> vector<16x32xf32>
    %121 = arith.addf %101, %120 : vector<16x32xf32>
    %122 = arith.addf %1, %121 : vector<16x32xf32>
    %c0_53 = arith.constant 0 : index
    %c0_54 = arith.constant 0 : index
    %123 = vector.load %arg10[%c0_53, %c0_54] : memref<1x32xf32, #tpu.memory_space<vmem>>, vector<1x32xf32>
    %124 = vector.broadcast %123 : vector<1x32xf32> to vector<16x32xf32>
    %125 = arith.addf %122, %124 : vector<16x32xf32>
    %c0_55 = arith.constant 0 : index
    %c0_56 = arith.constant 0 : index
    %126 = vector.load %arg11[%c0_55, %c0_56] : memref<1x32xf32, #tpu.memory_space<vmem>>, vector<1x32xf32>
    %c0_57 = arith.constant 0 : index
    %c0_58 = arith.constant 0 : index
    %127 = vector.load %arg12[%c0_57, %c0_58] : memref<1x32xf32, #tpu.memory_space<vmem>>, vector<1x32xf32>
    %cst_59 = arith.constant dense<0.000000e+00> : vector<16xf32>
    %128 = vector.multi_reduction <add>, %125, %cst_59 [1] : vector<16x32xf32> to vector<16xf32>
    %129 = vector.shape_cast %128 : vector<16xf32> to vector<16x1xf32>
    %cst_60 = arith.constant 3.200000e+01 : f32
    %130 = vector.broadcast %cst_60 : f32 to vector<16x1xf32>
    %131 = arith.divf %129, %130 : vector<16x1xf32>
    %132 = vector.broadcast %131 : vector<16x1xf32> to vector<16x32xf32>
    %133 = arith.subf %125, %132 : vector<16x32xf32>
    %134 = arith.mulf %133, %133 : vector<16x32xf32>
    %cst_61 = arith.constant dense<0.000000e+00> : vector<16xf32>
    %135 = vector.multi_reduction <add>, %134, %cst_61 [1] : vector<16x32xf32> to vector<16xf32>
    %136 = vector.shape_cast %135 : vector<16xf32> to vector<16x1xf32>
    %cst_62 = arith.constant 3.200000e+01 : f32
    %137 = vector.broadcast %cst_62 : f32 to vector<16x1xf32>
    %138 = arith.divf %136, %137 : vector<16x1xf32>
    %139 = vector.broadcast %131 : vector<16x1xf32> to vector<16x32xf32>
    %140 = arith.subf %125, %139 : vector<16x32xf32>
    %cst_63 = arith.constant 9.99999974E-6 : f32
    %141 = vector.broadcast %cst_63 : f32 to vector<16x1xf32>
    %142 = arith.addf %138, %141 : vector<16x1xf32>
    %143 = math.rsqrt %142 : vector<16x1xf32>
    %144 = vector.broadcast %143 : vector<16x1xf32> to vector<16x32xf32>
    %145 = arith.mulf %140, %144 : vector<16x32xf32>
    %146 = vector.broadcast %126 : vector<1x32xf32> to vector<16x32xf32>
    %147 = arith.mulf %145, %146 : vector<16x32xf32>
    %148 = vector.broadcast %127 : vector<1x32xf32> to vector<16x32xf32>
    %149 = arith.addf %147, %148 : vector<16x32xf32>
    %c0_64 = arith.constant 0 : index
    %c0_65 = arith.constant 0 : index
    %150 = vector.load %arg13[%c0_64, %c0_65] : memref<32x64xf32, #tpu.memory_space<vmem>>, vector<32x64xf32>
    %cst_66 = arith.constant dense<0.000000e+00> : vector<16x64xf32>
    %151 = tpu.matmul %149, %150, %cst_66 {dimension_numbers = #tpu.dot_dimension_numbers<[1], [0], [0], [1], [0, 0, 1, 1], [], []>} : vector<16x32xf32>, vector<32x64xf32>, vector<16x64xf32> -> vector<16x64xf32>
    %c0_67 = arith.constant 0 : index
    %c0_68 = arith.constant 0 : index
    %152 = vector.load %arg14[%c0_67, %c0_68] : memref<1x64xf32, #tpu.memory_space<vmem>>, vector<1x64xf32>
    %153 = vector.broadcast %152 : vector<1x64xf32> to vector<16x64xf32>
    %154 = arith.addf %151, %153 : vector<16x64xf32>
    %cst_69 = arith.constant 0.000000e+00 : f32
    %155 = vector.broadcast %cst_69 : f32 to vector<16x64xf32>
    %156 = arith.maximumf %154, %155 : vector<16x64xf32>
    %c0_70 = arith.constant 0 : index
    %c0_71 = arith.constant 0 : index
    %157 = vector.load %arg15[%c0_70, %c0_71] : memref<64x32xf32, #tpu.memory_space<vmem>>, vector<64x32xf32>
    %cst_72 = arith.constant dense<0.000000e+00> : vector<16x32xf32>
    %158 = tpu.matmul %156, %157, %cst_72 {dimension_numbers = #tpu.dot_dimension_numbers<[1], [0], [0], [1], [0, 0, 1, 1], [], []>} : vector<16x64xf32>, vector<64x32xf32>, vector<16x32xf32> -> vector<16x32xf32>
    %c0_73 = arith.constant 0 : index
    %c0_74 = arith.constant 0 : index
    %159 = vector.load %arg16[%c0_73, %c0_74] : memref<1x32xf32, #tpu.memory_space<vmem>>, vector<1x32xf32>
    %160 = vector.broadcast %159 : vector<1x32xf32> to vector<16x32xf32>
    %161 = arith.addf %158, %160 : vector<16x32xf32>
    %162 = arith.addf %125, %161 : vector<16x32xf32>
    %c0_75 = arith.constant 0 : index
    %c0_76 = arith.constant 0 : index
    %c0_77 = arith.constant 0 : index
    %163 = vector.load %arg17[%c0_75, %c0_76, %c0_77] : memref<1x16x32xf32, #tpu.memory_space<vmem>>, vector<1x16x32xf32>
    %164 = vector.shape_cast %163 : vector<1x16x32xf32> to vector<16x32xf32>
    %165 = vector.shape_cast %162 : vector<16x32xf32> to vector<1x16x32xf32>
    tpu.vector_store %arg17[%c0_75, %c0_76, %c0_77], %165 {strides = array<i32>} : memref<1x16x32xf32, #tpu.memory_space<vmem>>, vector<1x16x32xf32>,
    return
  }
  func.func @transform_0(%arg0: i32) -> (i32, i32, i32) {
    %c0_i32 = arith.constant 0 : i32
    %c0_i32_0 = arith.constant 0 : i32
    %c0_i32_1 = arith.constant 0 : i32
    return %arg0, %c0_i32, %c0_i32_0 : i32, i32, i32
  }
  func.func @transform_1(%arg0: i32) -> (i32, i32, i32) {
    %c0_i32 = arith.constant 0 : i32
    %c0_i32_0 = arith.constant 0 : i32
    %c0_i32_1 = arith.constant 0 : i32
    return %arg0, %c0_i32, %c0_i32_0 : i32, i32, i32
  }
  func.func @transform_2(%arg0: i32) -> (i32, i32) {
    %c0_i32 = arith.constant 0 : i32
    %c0_i32_0 = arith.constant 0 : i32
    %c0_i32_1 = arith.constant 0 : i32
    return %c0_i32, %c0_i32_0 : i32, i32
  }
  func.func @transform_3(%arg0: i32) -> (i32, i32) {
    %c0_i32 = arith.constant 0 : i32
    %c0_i32_0 = arith.constant 0 : i32
    %c0_i32_1 = arith.constant 0 : i32
    return %c0_i32, %c0_i32_0 : i32, i32
  }
  func.func @transform_4(%arg0: i32) -> (i32, i32) {
    %c0_i32 = arith.constant 0 : i32
    %c0_i32_0 = arith.constant 0 : i32
    %c0_i32_1 = arith.constant 0 : i32
    return %c0_i32, %c0_i32_0 : i32, i32
  }
  func.func @transform_5(%arg0: i32) -> (i32, i32) {
    %c0_i32 = arith.constant 0 : i32
    %c0_i32_0 = arith.constant 0 : i32
    %c0_i32_1 = arith.constant 0 : i32
    return %c0_i32, %c0_i32_0 : i32, i32
  }
  func.func @transform_6(%arg0: i32) -> (i32, i32) {
    %c0_i32 = arith.constant 0 : i32
    %c0_i32_0 = arith.constant 0 : i32
    %c0_i32_1 = arith.constant 0 : i32
    return %c0_i32, %c0_i32_0 : i32, i32
  }
  func.func @transform_7(%arg0: i32) -> (i32, i32) {
    %c0_i32 = arith.constant 0 : i32
    %c0_i32_0 = arith.constant 0 : i32
    %c0_i32_1 = arith.constant 0 : i32
    return %c0_i32, %c0_i32_0 : i32, i32
  }
  func.func @transform_8(%arg0: i32) -> (i32, i32) {
    %c0_i32 = arith.constant 0 : i32
    %c0_i32_0 = arith.constant 0 : i32
    %c0_i32_1 = arith.constant 0 : i32
    return %c0_i32, %c0_i32_0 : i32, i32
  }
  func.func @transform_9(%arg0: i32) -> (i32, i32) {
    %c0_i32 = arith.constant 0 : i32
    %c0_i32_0 = arith.constant 0 : i32
    %c0_i32_1 = arith.constant 0 : i32
    return %c0_i32, %c0_i32_0 : i32, i32
  }
  func.func @transform_10(%arg0: i32) -> (i32, i32) {
    %c0_i32 = arith.constant 0 : i32
    %c0_i32_0 = arith.constant 0 : i32
    %c0_i32_1 = arith.constant 0 : i32
    return %c0_i32, %c0_i32_0 : i32, i32
  }
  func.func @transform_11(%arg0: i32) -> (i32, i32) {
    %c0_i32 = arith.constant 0 : i32
    %c0_i32_0 = arith.constant 0 : i32
    %c0_i32_1 = arith.constant 0 : i32
    return %c0_i32, %c0_i32_0 : i32, i32
  }
  func.func @transform_12(%arg0: i32) -> (i32, i32) {
    %c0_i32 = arith.constant 0 : i32
    %c0_i32_0 = arith.constant 0 : i32
    %c0_i32_1 = arith.constant 0 : i32
    return %c0_i32, %c0_i32_0 : i32, i32
  }
  func.func @transform_13(%arg0: i32) -> (i32, i32) {
    %c0_i32 = arith.constant 0 : i32
    %c0_i32_0 = arith.constant 0 : i32
    %c0_i32_1 = arith.constant 0 : i32
    return %c0_i32, %c0_i32_0 : i32, i32
  }
  func.func @transform_14(%arg0: i32) -> (i32, i32) {
    %c0_i32 = arith.constant 0 : i32
    %c0_i32_0 = arith.constant 0 : i32
    %c0_i32_1 = arith.constant 0 : i32
    return %c0_i32, %c0_i32_0 : i32, i32
  }
  func.func @transform_15(%arg0: i32) -> (i32, i32) {
    %c0_i32 = arith.constant 0 : i32
    %c0_i32_0 = arith.constant 0 : i32
    %c0_i32_1 = arith.constant 0 : i32
    return %c0_i32, %c0_i32_0 : i32, i32
  }
  func.func @transform_16(%arg0: i32) -> (i32, i32, i32) {
    %c0_i32 = arith.constant 0 : i32
    %c0_i32_0 = arith.constant 0 : i32
    %c0_i32_1 = arith.constant 0 : i32
    return %arg0, %c0_i32, %c0_i32_0 : i32, i32, i32
  }
}

</mosaic_0001>

<bundles_post_ra>
// kernel: catr_backbone_forward.4
= control target key start
LH: loop header
LB: loop body
LE: loop exit
PB: predicated region body
PF: predicated region fallthrough
CT: control target
= control target key end

     0   :  { %v379_v0 = vmov 0.0|0.0   ;;  %vm59_vm0 = vcmask 523264   ;;  %vm273_vm1 = vcmask 261120   ;;  %s568_s1 = inlined_call_operand.vmem [shape: f32[192,64], index: 1, kind: input, shape index: {}]   ;;  %s569_s0 = inlined_call_operand.vmem [shape: f32[32,192], index: 0, kind: input, shape index: {}]   ;;  %s570_s3 = inlined_call_operand.vmem [shape: f32[64,32], index: 3, kind: input, shape index: {}]   ;;  %s571_s2 = inlined_call_operand.vmem [shape: f32[1,64], index: 2, kind: input, shape index: {}]   ;;  %s572_s4 = inlined_call_operand.vmem [shape: f32[1,32], index: 4, kind: input, shape index: {}]   ;;  %s573_s5 = inlined_call_operand.vmem [shape: f32[32,32], index: 5, kind: output, shape index: {}]  }
   0x1   :  { %326 = vmatprep.subr.bf16.mxu0 %v379_v0  ;;  %v28_v1 = vld [vmem:[%s568_s1] sm:$0xff]  ;;  %v29_v2 = vld [vmem:[%s568_s1 + $0x8] sm:$0xff]  ;;  %v30_v3 = vld [vmem:[%s568_s1 + $0x10] sm:$0xff] }
   0x2   :  { %v327_v4 = vpack.c.bf16 %v29_v2, %v28_v1  ;;  %v31_v5 = vld [vmem:[%s568_s1 + $0x18] sm:$0xff]  ;;  %v32_v7 = vld [vmem:[%s568_s1 + $0x20] sm:$0xff]  ;;  %v33_v8 = vld [vmem:[%s568_s1 + $0x28] sm:$0xff] }
   0x3   :  { %v330_v6 = vpack.c.bf16 %v31_v5, %v30_v3  ;;  %v333_v9 = vpack.c.bf16 %v33_v8, %v32_v7  ;;  %v34_v10 = vld [vmem:[%s568_s1 + $0x30] sm:$0xff]  ;;  %v35_v11 = vld [vmem:[%s568_s1 + $0x38] sm:$0xff]  ;;  %v21_v12 = vld [vmem:[%s569_s0 + $0x8] sm:$0xff] }
   0x4   :  { %328 = vmatpush1.bf16.msra.mxu0 %v327_v4  ;;  %283 = vmatprep.mubr.msk.f32.mxu0 %vm59_vm0, %v21_v12  ;;  %v161_v13 = vld [vmem:[%s570_s3] sm:$0xff]  ;;  %v336_v14 = vpack.c.bf16 %v35_v11, %v34_v10  ;;  %v162_v15 = vld [vmem:[%s570_s3 + $0x8] sm:$0xff]  ;;  %v163_v16 = vld [vmem:[%s570_s3 + $0x10] sm:$0xff] }
   0x5   :  { %329 = vmatprep.subr.bf16.mxu0 %v379_v0  ;;  %v164_v17 = vld [vmem:[%s570_s3 + $0x18] sm:$0xff]  ;;  %v36_v18 = vld [vmem:[%s568_s1 + $0x40] sm:$0xff]  ;;  %v37_v19 = vld [vmem:[%s568_s1 + $0x48] sm:$0xff]  ;;  %v362_v20 = vpack.c.bf16 %v162_v15, %v161_v13 }
   0x6   :  { %v366_v21 = vpack.c.bf16 %v164_v17, %v163_v16  ;;  %v339_v22 = vpack.c.bf16 %v37_v19, %v36_v18  ;;  %v38_v23 = vld [vmem:[%s568_s1 + $0x50] sm:$0xff]  ;;  %v39_v24 = vld [vmem:[%s568_s1 + $0x58] sm:$0xff]  ;;  %v40_v26 = vld [vmem:[%s568_s1 + $0x60] sm:$0xff] }
   0x7   :  { %363 = vmatprep.subr.bf16.mxu1 %v362_v20  ;;  %v342_v25 = vpack.c.bf16 %v39_v24, %v38_v23  ;;  %v41_v27 = vld [vmem:[%s568_s1 + $0x68] sm:$0xff]  ;;  %v42_v29 = vld [vmem:[%s568_s1 + $0x70] sm:$0xff]  ;;  %v43_v30 = vld [vmem:[%s568_s1 + $0x78] sm:$0xff] }
   0x8   :  { %331 = vmatpush1.bf16.msra.mxu0 %v330_v6  ;;  %365 = vmatpush3.bf16.msra.mxu1 %v362_v20  ;;  %v345_v28 = vpack.c.bf16 %v41_v27, %v40_v26  ;;  %v348_v31 = vpack.c.bf16 %v43_v30, %v42_v29  ;;  %v44_v32 = vld [vmem:[%s568_s1 + $0x80] sm:$0xff]  ;;  %v45_v33 = vld [vmem:[%s568_s1 + $0x88] sm:$0xff]  ;;  %v46_v35 = vld [vmem:[%s568_s1 + $0x90] sm:$0xff] }
   0x9   :  { %332 = vmatprep.subr.bf16.mxu0 %v379_v0  ;;  %367 = vmatprep.subr.bf16.mxu1 %v366_v21  ;;  %v351_v34 = vpack.c.bf16 %v45_v33, %v44_v32  ;;  %v47_v36 = vld [vmem:[%s568_s1 + $0x98] sm:$0xff]  ;;  %v48_v38 = vld [vmem:[%s568_s1 + $0xa0] sm:$0xff]  ;;  %v49_v39 = vld [vmem:[%s568_s1 + $0xa8] sm:$0xff] }
   0xa   :  { %v354_v37 = vpack.c.bf16 %v47_v36, %v46_v35  ;;  %v357_v40 = vpack.c.bf16 %v49_v39, %v48_v38  ;;  %v50_v41 = vld [vmem:[%s568_s1 + $0xb0] sm:$0xff]  ;;  %v51_v42 = vld [vmem:[%s568_s1 + $0xb8] sm:$0xff]  ;;  %v20_v44 = vld [vmem:[%s569_s0] sm:$0xff] }
   0xb   :  { %v360_v43 = vpack.c.bf16 %v51_v42, %v50_v41  ;;  %v23_v45 = vld [vmem:[%s569_s0 + $0x18] sm:$0xff]  ;;  %v22_v46 = vld [vmem:[%s569_s0 + $0x10] sm:$0xff]  ;;  %v25_v47 = vld [vmem:[%s569_s0 + $0x28] sm:$0xff] }
   0xc   :  { %334 = vmatpush1.bf16.msra.mxu0 %v333_v9  ;;  %369 = vmatpush3.bf16.msra.mxu1 %v366_v21  ;;  %v24_v48 = vld [vmem:[%s569_s0 + $0x20] sm:$0xff]  ;;  %v27_v49 = vld [vmem:[%s569_s0 + $0x38] sm:$0xff]  ;;  %v26_v50 = vld [vmem:[%s569_s0 + $0x30] sm:$0xff] }
   0xd   :  { %335 = vmatprep.subr.bf16.mxu0 %v379_v0  ;;  %v165_v51 = vld [vmem:[%s570_s3 + $0x20] sm:$0xff]  ;;  %v166_v52 = vld [vmem:[%s570_s3 + $0x28] sm:$0xff]  ;;  %v167_v54 = vld [vmem:[%s570_s3 + $0x30] sm:$0xff] }
   0xe   :  { %v370_v53 = vpack.c.bf16 %v166_v52, %v165_v51  ;;  %v168_v55 = vld [vmem:[%s570_s3 + $0x38] sm:$0xff]  ;;  %v282_v57 = vld [vmem:[%s571_s2] ss:$0 sm:$0xff] }
   0xf   :  { %v374_v56 = vpack.c.bf16 %v168_v55, %v167_v54  ;;  %v287_v10 = vld [vmem:[%s572_s4] ss:$0 sm:$0xff] }
  0x10   :  { %337 = vmatpush1.bf16.msra.mxu0 %v336_v14  ;;  %371 = vmatprep.subr.bf16.mxu1 %v370_v53 }
  0x11   :  { %338 = vmatprep.subr.bf16.mxu0 %v379_v0  ;;  %373 = vmatpush3.bf16.msra.mxu1 %v370_v53 }
  0x12   :  { %375 = vmatprep.subr.bf16.mxu1 %v374_v56 }
  0x14   :  { %340 = vmatpush1.bf16.msra.mxu0 %v339_v22 }
  0x15   :  { %341 = vmatprep.subr.bf16.mxu0 %v379_v0  ;;  %377 = vmatpush3.bf16.msra.mxu1 %v374_v56 }
  0x18   :  { %343 = vmatpush1.bf16.msra.mxu0 %v342_v25 }
  0x19   :  { %344 = vmatprep.subr.bf16.mxu0 %v379_v0 }
  0x1c   :  { %346 = vmatpush1.bf16.msra.mxu0 %v345_v28 }
  0x1d   :  { %347 = vmatprep.subr.bf16.mxu0 %v379_v0 }
  0x20   :  { %349 = vmatpush1.bf16.msra.mxu0 %v348_v31 }
  0x21   :  { %350 = vmatprep.subr.bf16.mxu0 %v379_v0 }
  0x24   :  { %352 = vmatpush1.bf16.msra.mxu0 %v351_v34 }
  0x25   :  { %353 = vmatprep.subr.bf16.mxu0 %v379_v0 }
  0x28   :  { %355 = vmatpush1.bf16.msra.mxu0 %v354_v37 }
  0x29   :  { %356 = vmatprep.subr.bf16.mxu0 %v379_v0 }
  0x2c   :  { %358 = vmatpush1.bf16.msra.mxu0 %v357_v40 }
  0x2d   :  { %359 = vmatprep.subr.bf16.mxu0 %v379_v0 }
  0x30   :  { %361 = vmatpush1.bf16.msra.mxu0 %v360_v43 }
  0x33   :  { %137 = vmatmul.mubr.f32.vlgmr.msra.gmra.mrb[0].mxu0 %v20_v44 }
  0x34   :  { %284 = vmatprep.mubr.msk.f32.mxu0 %vm59_vm0, %v23_v45 }
  0x37   :  { %142 = vmatmul.mubr.f32.gmra.mrb[2].mxu0 %v22_v46 }
  0x38   :  { %285 = vmatprep.mubr.msk.f32.mxu0 %vm59_vm0, %v25_v47 }
  0x3b   :  { %147 = vmatmul.mubr.f32.gmra.mrb[4].mxu0 %v24_v48 }
  0x3c   :  { %286 = vmatprep.mubr.msk.f32.mxu0 %vm59_vm0, %v27_v49 }
  0x3f   :  { %152 = vmatmul.mubr.f32.gmra.mrb[6].mxu0 %v26_v50 }
 0x106   :  { %v138_v58 = vpop.f32.mrb[0].mxu0 }
 0x107   :  { %v139_v59 = vadd.f32 %v282_v57, %v138_v58  ;;  %v140_v60 = vpop.f32.mrb[1].mxu0 }
 0x109   :  { %v157_v61 = vmax.f32 %v139_v59, 0.0 }
 0x10a   :  { %v143_v62 = vpop.f32.mrb[2].mxu0 }
 0x10b   :  { %v144_v63 = vadd.f32 %v282_v57, %v143_v62  ;;  %v145_v0 = vpop.f32.mrb[3].mxu0  ;;  %320 = vmatprep.mubr.msk.f32.mxu1 %vm59_vm0, %v157_v61 }
 0x10d   :  { %v158_v1 = vmax.f32 %v144_v63, 0.0 }
 0x10e   :  { %v148_v2 = vpop.f32.mrb[4].mxu0 }
 0x10f   :  { %v149_v3 = vadd.f32 %v282_v57, %v148_v2  ;;  %v150_v4 = vpop.f32.mrb[5].mxu0  ;;  %321 = vmatmul.mubr.msk.f32.vlgmr.msra.gmra.mrb[0].mxu1 %vm59_vm0, %v158_v1 }
 0x111   :  { %v159_v5 = vmax.f32 %v149_v3, 0.0 }
 0x112   :  { %v153_v6 = vpop.f32.mrb[6].mxu0 }
 0x113   :  { %v154_v7 = vadd.f32 %v282_v57, %v153_v6  ;;  %v155_v8 = vpop.f32.mrb[7].mxu0  ;;  %323 = vmatprep.mubr.msk.f32.mxu1 %vm59_vm0, %v159_v5 }
 0x115   :  { %v160_v9 = vmax.f32 %v154_v7, 0.0 }
 0x117   :  { %324 = vmatmul.mubr.msk.f32.gmra.mrb[2].mxu1 %vm59_vm0, %v160_v9 }
 0x1e2   :  { %v322_v11 = vpop.f32.mrb[0].mxu1 }
 0x1e3   :  { %v260_v12 = vadd.f32 %v322_v11, %v287_v10  ;;  %v254_v13 = vpop.f32.mrb[1].mxu1 }
 0x1e4   :  { %v255_v14 = vadd.f32 %v287_v10, %v254_v13 }
 0x1e5   :  { %275 = vst.msk [vmem:[%s573_s5 + $0x8] sm:$0xff] %vm273_vm1, %v260_v12 }
 0x1e6   :  { %274 = vst.msk [vmem:[%s573_s5] sm:$0xff] %vm273_vm1, %v255_v14 }
 0x1ea   :  { %v325_v15 = vpop.f32.mrb[2].mxu1 }
 0x1eb   :  { %v270_v16 = vadd.f32 %v325_v15, %v287_v10  ;;  %v264_v17 = vpop.f32.mrb[3].mxu1 }
 0x1ec   :  { %v265_v18 = vadd.f32 %v287_v10, %v264_v17 }
 0x1ed   :  { %277 = vst.msk [vmem:[%s573_s5 + $0x18] sm:$0xff] %vm273_vm1, %v270_v16 }
 0x1ee   :  { %276 = vst.msk [vmem:[%s573_s5 + $0x10] sm:$0xff] %vm273_vm1, %v265_v18 }

// kernel: catr_backbone_forward.7
= control target key start
LH: loop header
LB: loop body
LE: loop exit
PB: predicated region body
PF: predicated region fallthrough
CT: control target
= control target key end

     0   :  { %vm20_vm0 = vcmask 261120   ;;  %s174_s0 = inlined_call_operand.vmem [shape: f32[32,32], index: 0, kind: input, shape index: {}]   ;;  %s175_s1 = inlined_call_operand.vmem [shape: f32[1,32], index: 1, kind: input, shape index: {}]   ;;  %s176_s2 = inlined_call_operand.vmem [shape: f32[1,32], index: 2, kind: input, shape index: {}]   ;;  %s177_s3 = inlined_call_operand.vmem [shape: f32[32,32], index: 3, kind: output, shape index: {}]  }
   0x1   :  { %v14_v0 = vld [vmem:[%s174_s0] sm:$0xff]  ;;  %v16_v1 = vld [vmem:[%s174_s0 + $0x10] sm:$0xff]  ;;  %v15_v2 = vld [vmem:[%s174_s0 + $0x8] sm:$0xff] }
   0x2   :  { %v21_v3 = vsel %vm20_vm0, %v14_v0, 0.0  ;;  %v27_v4 = vsel %vm20_vm0, %v16_v1, 0.0  ;;  %v17_v5 = vld [vmem:[%s174_s0 + $0x18] sm:$0xff]  ;;  %v24_v6 = vsel %vm20_vm0, %v15_v2, 0.0  ;;  %v102_v41 = vld [vmem:[%s175_s1] ss:$0 sm:$0xff] }
   0x3   :  { %22 = vadd.xlane.f32.xlu0 %v21_v3  ;;  %28 = vadd.xlane.f32.xlu1 %v27_v4  ;;  %v30_v7 = vsel %vm20_vm0, %v17_v5, 0.0  ;;  %v103_v43 = vld [vmem:[%s176_s2] ss:$0 sm:$0xff] }
   0x7   :  { %25 = vadd.xlane.f32.xlu0 %v24_v6  ;;  %31 = vadd.xlane.f32.xlu1 %v30_v7 }
  0x90   :  { %v23_v8 = vpop.xlane.xlu0 %22  ;;  %v29_v9 = vpop.xlane.xlu1 %28 }
  0x91   :  { %v34_v10 = vmul.f32 0.03125, %v23_v8  ;;  %v36_v11 = vmul.f32 0.03125, %v29_v9 }
  0x93   :  { %v38_v12 = vsub.f32 %v14_v0, %v34_v10  ;;  %v40_v13 = vsub.f32 %v16_v1, %v36_v11 }
  0x94   :  { %v26_v14 = vpop.xlane.xlu0 %25  ;;  %v32_v15 = vpop.xlane.xlu1 %31 }
  0x95   :  { %v35_v16 = vmul.f32 0.03125, %v26_v14  ;;  %v37_v17 = vmul.f32 0.03125, %v32_v15  ;;  %v42_v18 = vmul.f32 %v38_v12, %v38_v12  ;;  %v44_v19 = vmul.f32 %v40_v13, %v40_v13 }
  0x97   :  { %v39_v20 = vsub.f32 %v15_v2, %v35_v16  ;;  %v41_v21 = vsub.f32 %v17_v5, %v37_v17  ;;  %v46_v22 = vsel %vm20_vm0, %v42_v18, 0.0  ;;  %v52_v23 = vsel %vm20_vm0, %v44_v19, 0.0 }
  0x98   :  { %47 = vadd.xlane.f32.xlu0 %v46_v22 }
  0x99   :  { %v43_v24 = vmul.f32 %v39_v20, %v39_v20  ;;  %v45_v25 = vmul.f32 %v41_v21, %v41_v21 }
  0x9b   :  { %v49_v26 = vsel %vm20_vm0, %v43_v24, 0.0  ;;  %v55_v27 = vsel %vm20_vm0, %v45_v25, 0.0 }
  0x9c   :  { %53 = vadd.xlane.f32.xlu0 %v52_v23  ;;  %50 = vadd.xlane.f32.xlu1 %v49_v26 }
  0xa0   :  { %56 = vadd.xlane.f32.xlu1 %v55_v27 }
 0x125   :  { %v48_v28 = vpop.xlane.xlu0 %47 }
 0x126   :  { %v58_v29 = vmul.f32 0.03125, %v48_v28 }
 0x128   :  { %v62_v30 = vadd.f32 1e-05, %v58_v29 }
 0x129   :  { %v51_v31 = vpop.xlane.xlu1 %50  ;;  %v54_v32 = vpop.xlane.xlu0 %53 }
 0x12a   :  { %104 = vrsqrt.f32 %v62_v30  ;;  %v59_v33 = vmul.f32 0.03125, %v51_v31  ;;  %v60_v34 = vmul.f32 0.03125, %v54_v32 }
 0x12c   :  { %v63_v35 = vadd.f32 1e-05, %v59_v33  ;;  %v64_v36 = vadd.f32 1e-05, %v60_v34 }
 0x12d   :  { %v57_v37 = vpop.xlane.xlu1 %56 }
 0x12e   :  { %106 = vrsqrt.f32 %v63_v35  ;;  %v61_v38 = vmul.f32 0.03125, %v57_v37 }
 0x12f   :  { %108 = vrsqrt.f32 %v64_v36 }
 0x130   :  { %v65_v39 = vadd.f32 1e-05, %v61_v38 }
 0x132   :  { %110 = vrsqrt.f32 %v65_v39 }
 0x134   :  { %v105_v40 = vpop.eup %104 }
 0x135   :  { %v70_v42 = vmul.f32 %v105_v40, %v38_v12 }
 0x137   :  { %v80_v44 = vmul.f32 %v102_v41, %v70_v42 }
 0x138   :  { %v107_v45 = vpop.eup %106 }
 0x139   :  { %v109_v46 = vpop.eup %108  ;;  %v90_v47 = vadd.f32 %v103_v43, %v80_v44  ;;  %v71_v48 = vmul.f32 %v107_v45, %v39_v20 }
 0x13a   :  { %v72_v49 = vmul.f32 %v109_v46, %v40_v13 }
 0x13b   :  { %94 = vst.msk [vmem:[%s177_s3] sm:$0xff] %vm20_vm0, %v90_v47  ;;  %v81_v50 = vmul.f32 %v102_v41, %v71_v48 }
 0x13c   :  { %v111_v51 = vpop.eup %110  ;;  %v82_v52 = vmul.f32 %v102_v41, %v72_v49 }
 0x13d   :  { %v91_v53 = vadd.f32 %v103_v43, %v81_v50  ;;  %v73_v54 = vmul.f32 %v111_v51, %v41_v21 }
 0x13e   :  { %v92_v55 = vadd.f32 %v103_v43, %v82_v52 }
 0x13f   :  { %95 = vst.msk [vmem:[%s177_s3 + $0x8] sm:$0xff] %vm20_vm0, %v91_v53  ;;  %v83_v56 = vmul.f32 %v102_v41, %v73_v54 }
 0x140   :  { %96 = vst.msk [vmem:[%s177_s3 + $0x10] sm:$0xff] %vm20_vm0, %v92_v55 }
 0x141   :  { %v93_v57 = vadd.f32 %v103_v43, %v83_v56 }
 0x143   :  { %97 = vst.msk [vmem:[%s177_s3 + $0x18] sm:$0xff] %vm20_vm0, %v93_v57 }

// kernel: catr_backbone_forward.5
= control target key start
LH: loop header
LB: loop body
LE: loop exit
PB: predicated region body
PF: predicated region fallthrough
CT: control target
= control target key end

     0   :  { %s2772_s21 = smov 0   ;;  %s3031_s0 = inlined_call_operand.vmem [shape: f32[2,16,32], index: 0, kind: input, shape index: {}]   ;;  %s3032_s1 = inlined_call_operand.vmem [shape: f32[2,16,32], index: 1, kind: input, shape index: {}]   ;;  %s3033_s2 = inlined_call_operand.vmem [shape: f32[1,32], index: 2, kind: input, shape index: {}]   ;;  %s3034_s3 = inlined_call_operand.vmem [shape: f32[1,32], index: 3, kind: input, shape index: {}]   ;;  %s3035_s4 = inlined_call_operand.vmem [shape: f32[32,64], index: 4, kind: input, shape index: {}]   ;;  %s3036_s5 = inlined_call_operand.vmem [shape: f32[1,64], index: 5, kind: input, shape index: {}]   ;;  %s3037_s6 = inlined_call_operand.vmem [shape: f32[32,32], index: 6, kind: input, shape index: {}]   ;;  %s3038_s7 = inlined_call_operand.vmem [shape: f32[1,32], index: 7, kind: input, shape index: {}]   ;;  %s3039_s8 = inlined_call_operand.vmem [shape: f32[32,32], index: 8, kind: input, shape index: {}]   ;;  %s3040_s9 = inlined_call_operand.vmem [shape: f32[1,32], index: 9, kind: input, shape index: {}]   ;;  %s3041_s10 = inlined_call_operand.vmem [shape: f32[1,32], index: 10, kind: input, shape index: {}]   ;;  %s3042_s11 = inlined_call_operand.vmem [shape: f32[1,32], index: 11, kind: input, shape index: {}]   ;;  %s3043_s12 = inlined_call_operand.vmem [shape: f32[32,64], index: 12, kind: input, shape index: {}]   ;;  %s3044_s13 = inlined_call_operand.vmem [shape: f32[1,64], index: 13, kind: input, shape index: {}]   ;;  %s3045_s14 = inlined_call_operand.vmem [shape: f32[64,32], index: 14, kind: input, shape index: {}]   ;;  %s3046_s15 = inlined_call_operand.vmem [shape: f32[1,32], index: 15, kind: input, shape index: {}]   ;;  %s3047_s16 = inlined_call_operand.vmem [shape: f32[2,16,32], index: 16, kind: output, shape index: {}]  }
   0x1   :  { %3048 = sst [smem:[#allocation2_spill]] %s3031_s0 }
   0x2 LB: > { %s2231_s22 = sadd.s32 4294967295, %s2678_s21   ;;  %p2235_p0 = scmp.ge.s32.totalorder %s2678_s21, 1  ;;  %s2678_s21 = sphi %s2772_s21, %s26_s21  }
   0x3   : > { %p472_p1 = scmp.lt.s32.totalorder %s2678_s21, 3 }
   0x5   : > { %p473_p2 = pnand %p2235_p0, %p472_p1 }
   0x6   : > { %p527_p3 = scmp.lt.s32.totalorder (!%p473_p2), %s2231_s22, 1  ;;  %vm548_vm0 = vcmask (!%p473_p2), 261120   ;;  %s3049_s26 = sld [smem:[#allocation2_spill]] (!%p473_p2)  ;;  %v594_v14 = vld [vmem:[%s3035_s4] sm:$0xff] (!%p473_p2)  ;;  %v595_v15 = vld [vmem:[%s3035_s4 + $0x8] sm:$0xff] (!%p473_p2)  ;;  %v596_v16 = vld [vmem:[%s3035_s4 + $0x10] sm:$0xff] (!%p473_p2) }
   0x7   : > { %476 = sbr.rel (%p473_p2) target bundleno = 3480 (0xd98), region = 84  ;;  %v2496_v17 = vpack.c.bf16 (!%p473_p2), %v595_v15, %v594_v14  ;;  %v597_v18 = vld [vmem:[%s3035_s4 + $0x18] sm:$0xff] (!%p473_p2)  ;;  %v686_v20 = vld [vmem:[%s3037_s6] sm:$0xff] (!%p473_p2)  ;;  %v687_v21 = vld [vmem:[%s3037_s6 + $0x8] sm:$0xff] (!%p473_p2)  ;;  %vm784_vm1 = vcmask (!%p473_p2), 64512   ;;  %s2681_s30 = smov (!%p473_p2), 120  }
   0x8   : > { %v2500_v19 = vpack.c.bf16 (!%p473_p2), %v597_v18, %v596_v16  ;;  %v2504_v22 = vpack.c.bf16 (!%p473_p2), %v687_v21, %v686_v20  ;;  %v2242_v30 = vld [vmem:[%s3033_s2] ss:$0 sm:$0xff] (!%p473_p2)  ;;  %v688_v41 = vld [vmem:[%s3037_s6 + $0x10] sm:$0xff] (!%p473_p2)  ;;  %v689_v42 = vld [vmem:[%s3037_s6 + $0x18] sm:$0xff] (!%p473_p2)  ;;  %s2683_s17 = smov (!%p473_p2), 112   ;;  %vm870_vm3 = vcmask (!%p473_p2), 130048  }
   0x9   : > { %2497 = vmatprep.subr.bf16.mxu1 (!%p473_p2), %v2496_v17  ;;  %v2243_v32 = vld [vmem:[%s3034_s3] ss:$0 sm:$0xff] (!%p473_p2)  ;;  %v2508_v45 = vpack.c.bf16 (!%p473_p2), %v689_v42, %v688_v41  ;;  %vm2864_vm2 = vmpackc.low (!%p473_p2), %vm784_vm1, %vm784_vm1  ;;  %s2684_s18 = smov (!%p473_p2), 88   ;;  %s2685_s19 = smov (!%p473_p2), 104   ;;  %vm2078_vm4 = vcmask (!%p473_p2), 523264  }
   0xa   : > { %2499 = vmatpush3.bf16.msra.mxu1 (!%p473_p2), %v2496_v17  ;;  %v2244_v46 = vld [vmem:[%s3036_s5] ss:$0 sm:$0xff] (!%p473_p2)  ;;  %s2686_s20 = smov (!%p473_p2), 72  }
   0xb   : > { %2501 = vmatprep.subr.bf16.mxu1 (!%p473_p2), %v2500_v19  ;;  %v2247_v52 = vld [vmem:[%s3038_s7] ss:$0 sm:$0xff] (!%p473_p2) }
   0xc   : > { %v974_v62 = vld [vmem:[%s3039_s8] sm:$0xff] (!%p473_p2) }
   0xe   : > { %s3053_s22 = smov (!%p527_p3, %s2231_s22), 1  ;;  %2503 = vmatpush3.bf16.msra.mxu1 %v2500_v19 }
   0xf   : > { %s2780_s23 = sshll.u32 %s3053_s22, 4  ;;  %2505 = vmatprep.subr.bf16.mxu1 %v2504_v22 }
  0x10   : > { %s531_s27 = scalar_lea.vmem %s3049_s26, %s2780_s23  ;;  %s536_s0 = scalar_lea.vmem %s3032_s1, %s2780_s23 }
  0x11   : > { %v2786_v0 = vld [vmem:[%s531_s27] sm:$0xff]  ;;  %v2788_v1 = vld [vmem:[%s531_s27 + $0x8] sm:$0xff]  ;;  %s2680_s27 = smov 96   ;;  %s541_s28 = scalar_lea.vmem %s3047_s16, %s2780_s23 }
  0x12   : > { %v549_v2 = vsel %vm548_vm0, %v2786_v0, 0.0  ;;  %v552_v3 = vsel %vm548_vm0, %v2788_v1, 0.0  ;;  %v544_v35 = vld [vmem:[%s536_s0] sm:$0xff]  ;;  %v545_v40 = vld [vmem:[%s536_s0 + $0x8] sm:$0xff]  ;;  %s2682_s0 = smov 80  }
  0x13   : > { %550 = vadd.xlane.f32.xlu0 %v549_v2 }
  0x17   : > { %553 = vadd.xlane.f32.xlu0 %v552_v3 }
  0xa0   : > { %v551_v4 = vpop.xlane.xlu0 %550 }
  0xa1   : > { %v556_v5 = vmul.f32 0.03125, %v551_v4 }
  0xa3   : > { %v558_v6 = vsub.f32 %v2786_v0, %v556_v5 }
  0xa4   : > { %v554_v7 = vpop.xlane.xlu0 %553 }
  0xa5   : > { %v557_v8 = vmul.f32 0.03125, %v554_v7  ;;  %v560_v9 = vmul.f32 %v558_v6, %v558_v6 }
  0xa7   : > { %v559_v10 = vsub.f32 %v2788_v1, %v557_v8  ;;  %v562_v11 = vsel %vm548_vm0, %v560_v9, 0.0 }
  0xa8   : > { %563 = vadd.xlane.f32.xlu1 %v562_v11 }
  0xa9   : > { %v561_v12 = vmul.f32 %v559_v10, %v559_v10 }
  0xab   : > { %v565_v13 = vsel %vm548_vm0, %v561_v12, 0.0 }
  0xac   : > { %566 = vadd.xlane.f32.xlu1 %v565_v13 }
 0x135   : > { %v564_v23 = vpop.xlane.xlu1 %563 }
 0x136   : > { %v568_v24 = vmul.f32 0.03125, %v564_v23 }
 0x138   : > { %v570_v25 = vadd.f32 1e-05, %v568_v24 }
 0x139   : > { %v567_v26 = vpop.xlane.xlu1 %566 }
 0x13a   : > { %2632 = vrsqrt.f32 %v570_v25  ;;  %v569_v27 = vmul.f32 0.03125, %v567_v26 }
 0x13c   : > { %v571_v28 = vadd.f32 1e-05, %v569_v27 }
 0x13e   : > { %2634 = vrsqrt.f32 %v571_v28 }
 0x144   : > { %v2633_v29 = vpop.eup %2632 }
 0x145   : > { %v574_v31 = vmul.f32 %v2633_v29, %v558_v6 }
 0x147   : > { %v582_v33 = vmul.f32 %v2242_v30, %v574_v31 }
 0x148   : > { %v2635_v34 = vpop.eup %2634 }
 0x149   : > { %v575_v36 = vmul.f32 %v2635_v34, %v559_v10  ;;  %v590_v37 = vadd.f32 %v2243_v32, %v582_v33 }
 0x14b   : > { %v583_v38 = vmul.f32 %v2242_v30, %v575_v36  ;;  %v592_v39 = vadd.f32 %v590_v37, %v544_v35 }
 0x14d   : > { %v591_v43 = vadd.f32 %v2243_v32, %v583_v38  ;;  %2376 = vmatprep.mubr.msk.f32.mxu1 %vm548_vm0, %v592_v39 }
 0x14f   : > { %v593_v44 = vadd.f32 %v591_v43, %v545_v40 }
 0x151   : > { %2377 = vmatmul.mubr.msk.f32.vlgmr.msra.gmra.mrb[0].mxu1 %vm548_vm0, %v593_v44 }
 0x152   : > { %2507 = vmatpush3.bf16.msra.mxu1 %v2504_v22  ;;  %2387 = vmatprep.mubr.msk.f32.mxu1 %vm548_vm0, %v590_v37 }
 0x153   : > { %2509 = vmatprep.subr.bf16.mxu1 %v2508_v45 }
 0x156   : > { %2511 = vmatpush3.bf16.msra.mxu1 %v2508_v45 }
 0x159   : > { %2388 = vmatmul.mubr.msk.f32.vlgmr.msra.gmra.mrb[2].mxu1 %vm548_vm0, %v591_v43 }
 0x224   : > { %v2378_v47 = vpop.f32.mrb[0].mxu1 }
 0x225   : > { %v2839_v48 = vadd.f32 %v2378_v47, %v2244_v46  ;;  %v677_v49 = vpop.f32.mrb[1].mxu1 }
 0x226   : > { %v2841_v50 = vadd.f32 %v2244_v46, %v677_v49 }
 0x228   : > { %2394 = vmatprep.mubr.msk.f32.mxu0 %vm784_vm1, %v2841_v50  ;;  %v2847_v51 = vpack.i.bf16 %v2839_v48, %v2841_v50 }
 0x22a   : > { %2598 = vrot.lane.b32.xlu0 %v2847_v51, %s2680_s27 }
 0x22c   : > { %v2389_v53 = vpop.f32.mrb[2].mxu1 }
 0x22d   : > { %v775_v54 = vadd.f32 %v2389_v53, %v2247_v52  ;;  %v769_v55 = vpop.f32.mrb[3].mxu1 }
 0x22e   : > { %v770_v56 = vadd.f32 %v2247_v52, %v769_v55  ;;  %975 = vrot.lane.b32.xlu0 %v2841_v50, %s2681_s30 }
 0x230   : > { %v2518_v57 = vpack.c.bf16 %v775_v54, %v770_v56  ;;  %v2855_v58 = vpack.i.bf16 %v775_v54, %v770_v56 }
 0x232   : > { %2519 = vmatprep.subr.bf16.mxu1 %v2518_v57  ;;  %977 = vrot.lane.b32.xlu0 %v2839_v48, %s2681_s30 }
 0x233   : > { %2521 = vmatpush3.bf16.msra.mxu1 %v2518_v57 }
 0x236   : > { %2608 = vrot.lane.b32.xlu0 %v2847_v51, %s2682_s0 }
 0x23a   : > { %1344 = vrot.lane.b32.xlu0 %v2839_v48, %s2683_s17 }
 0x29c   : > { %v2599_v59 = vpop.permute.xlu0 %2598 }
 0x29d   : > { %v2601_v60 = vunpack.i.h.bf16 %v2599_v59  ;;  %v2600_v61 = vunpack.i.l.bf16 %v2599_v59 }
 0x29f   : > { %v2512_v63 = vpack.c.bf16 %v2601_v60, %v2600_v61 }
 0x2a0   : > { %v976_v18 = vpop.permute.xlu0 %975 }
 0x2a1   : > { %2514 = vmatprep.subr.msk.bf16.mxu0 %vm2864_vm2, %v2512_v63 }
 0x2a2   : > { %2517 = vmatpush3.bf16.xpose.msk.msra.mxu0 %vm2864_vm2, %v2512_v63 }
 0x2a4   : > { %v978_v21 = vpop.permute.xlu0 %977 }
 0x2a8   : > { %v2609_v26 = vpop.permute.xlu0 %2608 }
 0x2a9   : > { %2395 = vmatmul.mubr.msk.f32.vlgmr.msra.gmra.mrb[0].mxu0 %vm784_vm1, %v2839_v48  ;;  %v2611_v29 = vunpack.i.h.bf16 %v2609_v26  ;;  %v2610_v30 = vunpack.i.l.bf16 %v2609_v26 }
 0x2ab   : > { %v2532_v33 = vpack.c.bf16 %v2611_v29, %v2610_v30 }
 0x2ac   : > { %v1345_v35 = vpop.permute.xlu0 %1344 }
 0x37c   : > { %v2396_v2 = vpop.f32.mrb[0].mxu0 }
 0x37d   : > { %v859_v3 = vpop.f32.mrb[1].mxu0  ;;  %v869_v5 = vmul.f32 0.35355338, %v2396_v2 }
 0x37e   : > { %v868_v4 = vmul.f32 0.35355338, %v859_v3 }
 0x37f   : > { %v874_v7 = vsel %vm870_vm3, %v869_v5, -inf }
 0x380   : > { %v871_v6 = vsel %vm870_vm3, %v868_v4, -inf }
 0x381   : > { %872 = vmax.xlane.f32.xlu1 %v871_v6 }
 0x385   : > { %875 = vmax.xlane.f32.xlu1 %v874_v7 }
 0x40e   : > { %v873_v8 = vpop.xlane.xlu1 %872 }
 0x40f   : > { %v877_v9 = vsub.f32 %v868_v4, %v873_v8 }
 0x411   : > { %v879_v12 = vmul.f32 1.442695, %v877_v9 }
 0x412   : > { %v876_v10 = vpop.xlane.xlu1 %875 }
 0x413   : > { %v878_v11 = vsub.f32 %v869_v5, %v876_v10 }
 0x415   : > { %v881_v13 = vmul.f32 1.442695, %v878_v11 }
 0x417   : > { %2636 = vpow2.f32 %v881_v13 }
 0x418   : > { %2638 = vpow2.f32 %v879_v12 }
 0x421   : > { %v2637_v14 = vpop.eup %2636 }
 0x422   : > { %v886_v15 = vsel %vm870_vm3, %v2637_v14, 0.0  ;;  %v2639_v16 = vpop.eup %2638 }
 0x423   : > { %887 = vadd.xlane.f32.xlu1 %v886_v15  ;;  %v883_v17 = vsel %vm870_vm3, %v2639_v16, 0.0 }
 0x427   : > { %884 = vadd.xlane.f32.xlu1 %v883_v17 }
 0x438   : > { %2603 = vrot.lane.b32.xlu1 %v2847_v51, %s2684_s18 }
 0x43c   : > { %1342 = vrot.lane.b32.xlu1 %v2841_v50, %s2683_s17 }
 0x4b0   : > { %v888_v19 = vpop.xlane.xlu1 %887 }
 0x4b1   : > { %2640 = vrcp.f32 %v888_v19 }
 0x4b4   : > { %v885_v20 = vpop.xlane.xlu1 %884 }
 0x4b5   : > { %2642 = vrcp.f32 %v885_v20 }
 0x4b8   : > { %v2604_v22 = vpop.permute.xlu1 %2603 }
 0x4b9   : > { %v2606_v23 = vunpack.i.h.bf16 %v2604_v22  ;;  %v2605_v24 = vunpack.i.l.bf16 %v2604_v22 }
 0x4bb   : > { %v2522_v25 = vpack.c.bf16 %v2606_v23, %v2605_v24  ;;  %v2641_v27 = vpop.eup %2640 }
 0x4bc   : > { %v892_v32 = vmul.f32 %v2641_v27, %v2637_v14  ;;  %v1343_v34 = vpop.permute.xlu1 %1342 }
 0x4bd   : > { %2524 = vmatprep.subr.msk.bf16.mxu1 %vm2864_vm2, %v2522_v25 }
 0x4bf   : > { %v2643_v28 = vpop.eup %2642 }
 0x4c0   : > { %v891_v31 = vmul.f32 %v2643_v28, %v2639_v16 }
 0x4c2   : > { %2401 = vmatprep.mubr.msk.f32.mxu1 %vm870_vm3, %v891_v31 }
 0x4c3   : > { %2402 = vmatmul.mubr.msk.f32.vlgmr.msra.gmra.mrb[4].mxu1 %vm870_vm3, %v892_v32 }
 0x4c4   : > { %2527 = vmatpush3.bf16.xpose.msk.msra.mxu1 %vm2864_vm2, %v2522_v25  ;;  %2408 = vmatprep.mubr.msk.f32.mxu1 %vm784_vm1, %v976_v18  ;;  %v1179_v25 = vld [vmem:[%s3039_s8 + $0x8] sm:$0xff] }
 0x4c5   : > { %2534 = vmatprep.subr.msk.bf16.mxu1 %vm2864_vm2, %v2532_v33 }
 0x4cb   : > { %2409 = vmatmul.mubr.msk.f32.vlgmr.msra.gmra.mrb[6].mxu1 %vm784_vm1, %v978_v21 }
 0x4cc   : > { %2537 = vmatpush3.bf16.xpose.msk.msra.mxu1 %vm2864_vm2, %v2532_v33  ;;  %2432 = vmatprep.mubr.msk.f32.mxu1 %vm784_vm1, %v1343_v34 }
 0x4d3   : > { %2433 = vmatmul.mubr.msk.f32.vlgmr.msra.gmra.mrb[8].mxu1 %vm784_vm1, %v1345_v35 }
 0x596   : > { %v2895_v36 = vpop.f32.mrb[4].mxu1 }
 0x597   : > { %v2897_v37 = vpop.f32.mrb[5].mxu1 }
 0x59e   : > { %v2410_v38 = vpop.f32.mrb[6].mxu1 }
 0x59f   : > { %v1067_v39 = vmul.f32 0.35355338, %v2410_v38  ;;  %v1057_v40 = vpop.f32.mrb[7].mxu1 }
 0x5a0   : > { %v1066_v41 = vmul.f32 0.35355338, %v1057_v40 }
 0x5a1   : > { %v1071_v42 = vsel %vm870_vm3, %v1067_v39, -inf }
 0x5a2   : > { %1072 = vmax.xlane.f32.xlu0 %v1071_v42  ;;  %v1068_v43 = vsel %vm870_vm3, %v1066_v41, -inf }
 0x5a3   : > { %1069 = vmax.xlane.f32.xlu1 %v1068_v43 }
 0x5a6   : > { %v2434_v44 = vpop.f32.mrb[8].mxu1 }
 0x5a7   : > { %v1424_v45 = vpop.f32.mrb[9].mxu1  ;;  %v1434_v7 = vmul.f32 0.35355338, %v2434_v44  ;;  %v1544_v44 = vld [vmem:[%s3039_s8 + $0x10] sm:$0xff] }
 0x5a8   : > { %v1433_v46 = vmul.f32 0.35355338, %v1424_v45 }
 0x5a9   : > { %v1438_v8 = vsel %vm870_vm3, %v1434_v7, -inf }
 0x5aa   : > { %v1435_v47 = vsel %vm870_vm3, %v1433_v46, -inf }
 0x5b4   : > { %2613 = vrot.lane.b32.xlu1 %v2855_v58, %s2681_s30 }
 0x5b8   : > { %1628 = vrot.lane.b32.xlu1 %v2841_v50, %s2685_s19 }
 0x5bc   : > { %1630 = vrot.lane.b32.xlu1 %v2839_v48, %s2685_s19 }
 0x5e0   : > { %1436 = vmax.xlane.f32.xlu1 %v1435_v47 }
 0x5f1   : > { %2623 = vrot.lane.b32.xlu1 %v2855_v58, %s2683_s17 }
 0x5f5   : > { %2628 = vrot.lane.b32.xlu1 %v2855_v58, %s2685_s19 }
 0x62f   : > { %v1073_v49 = vpop.xlane.xlu0 %1072 }
 0x630   : > { %v1075_v52 = vsub.f32 %v1067_v39, %v1073_v49  ;;  %v1070_v53 = vpop.xlane.xlu1 %1069 }
 0x631   : > { %v1074_v54 = vsub.f32 %v1066_v41, %v1070_v53 }
 0x632   : > { %v1078_v55 = vmul.f32 1.442695, %v1075_v52 }
 0x633   : > { %v1076_v56 = vmul.f32 1.442695, %v1074_v54 }
 0x634   : > { %v2614_v57 = vpop.permute.xlu1 %2613 }
 0x635   : > { %2644 = vpow2.f32 %v1076_v56  ;;  %v2616_v50 = vunpack.i.h.bf16 %v2614_v57  ;;  %v2615_v59 = vunpack.i.l.bf16 %v2614_v57 }
 0x636   : > { %2646 = vpow2.f32 %v1078_v55 }
 0x637   : > { %v2528_v48 = vpack.c.bf16 %v2616_v50, %v2615_v59 }
 0x638   : > { %v1629_v60 = vpop.permute.xlu1 %1628 }
 0x639   : > { %2529 = vmatprep.subr.bf16.mxu0 %v2528_v48  ;;  %2451 = vmatprep.mubr.msk.f32.mxu1 %vm784_vm1, %v1629_v60 }
 0x63a   : > { %2531 = vmatpush3.bf16.msra.mxu0 %v2528_v48 }
 0x63b   : > { %2418 = vmatprep.subr.mxu0 %v1179_v25 }
 0x63c   : > { %v1631_v3 = vpop.permute.xlu1 %1630 }
 0x63f   : > { %v2645_v61 = vpop.eup %2644 }
 0x640   : > { %v1080_v58 = vsel %vm870_vm3, %v2645_v61, 0.0  ;;  %v2647_v63 = vpop.eup %2646 }
 0x641   : > { %1081 = vadd.xlane.f32.xlu0 %v1080_v58  ;;  %v1083_v2 = vsel %vm870_vm3, %v2647_v63, 0.0 }
 0x645   : > { %1084 = vadd.xlane.f32.xlu0 %v1083_v2 }
 0x65b   : > { %2618 = vrot.lane.b32.xlu0 %v2847_v51, %s2686_s20 }
 0x66d   : > { %v1437_v4 = vpop.xlane.xlu1 %1436 }
 0x66e   : > { %v1441_v5 = vsub.f32 %v1433_v46, %v1437_v4 }
 0x670   : > { %v1443_v6 = vmul.f32 1.442695, %v1441_v5 }
 0x671   : > { %v2624_v27 = vpop.permute.xlu1 %2623 }
 0x672   : > { %2648 = vpow2.f32 %v1443_v6  ;;  %v2626_v29 = vunpack.i.h.bf16 %v2624_v27  ;;  %v2625_v30 = vunpack.i.l.bf16 %v2624_v27 }
 0x674   : > { %v2538_v33 = vpack.c.bf16 %v2626_v29, %v2625_v30  ;;  %v1972_v29 = vld [vmem:[%s3043_s12 + $0x18] sm:$0xff] }
 0x675   : > { %v2629_v42 = vpop.permute.xlu1 %2628 }
 0x676   : > { %v2631_v45 = vunpack.i.h.bf16 %v2629_v42  ;;  %v2630_v46 = vunpack.i.l.bf16 %v2629_v42 }
 0x678   : > { %v2548_v52 = vpack.c.bf16 %v2631_v45, %v2630_v46 }
 0x67a   : > { %1439 = vmax.xlane.f32.xlu0 %v1438_v8 }
 0x67c   : > { %v2649_v9 = vpop.eup %2648 }
 0x67d   : > { %v1447_v10 = vsel %vm870_vm3, %v2649_v9, 0.0 }
 0x67e   : > { %1448 = vadd.xlane.f32.xlu0 %v1447_v10 }
 0x6ce   : > { %v1082_v11 = vpop.xlane.xlu0 %1081 }
 0x6cf   : > { %2650 = vrcp.f32 %v1082_v11  ;;  %v2282_v11 = vld [vmem:[%s3040_s9] ss:$0 sm:$0xff] }
 0x6d2   : > { %v1085_v12 = vpop.xlane.xlu0 %1084 }
 0x6d3   : > { %2652 = vrcp.f32 %v1085_v12 }
 0x6d6   : > { %v2619_v13 = vpop.permute.xlu0 %2618 }
 0x6d7   : > { %v2621_v14 = vunpack.i.h.bf16 %v2619_v13  ;;  %v2620_v51 = vunpack.i.l.bf16 %v2619_v13 }
 0x6d9   : > { %v2651_v15 = vpop.eup %2650  ;;  %v2542_v16 = vpack.c.bf16 %v2621_v14, %v2620_v51 }
 0x6da   : > { %v1088_v17 = vmul.f32 %v2651_v15, %v2645_v61 }
 0x6db   : > { %2544 = vmatprep.subr.msk.bf16.mxu1 %vm2864_vm2, %v2542_v16 }
 0x6dc   : > { %2415 = vmatprep.mubr.msk.f32.mxu0 %vm870_vm3, %v1088_v17  ;;  %2547 = vmatpush3.bf16.xpose.msk.msra.mxu1 %vm2864_vm2, %v2542_v16 }
 0x6dd   : > { %v2653_v18 = vpop.eup %2652 }
 0x6de   : > { %v1089_v19 = vmul.f32 %v2653_v18, %v2647_v63  ;;  %v1830_v63 = vld [vmem:[%s3039_s8 + $0x18] sm:$0xff] }
 0x6e0   : > { %2416 = vmatmul.mubr.msk.f32.vlgmr.msra.gmra.mrb[2].mxu0 %vm870_vm3, %v1089_v19 }
 0x6e1   : > { %2419 = vmatpush3.msra.mxu0 %v1179_v25 }
 0x6e2   : > { %2423 = vmatprep.subr.mxu0 %v974_v62 }
 0x6e3   : > { %2452 = vmatmul.mubr.msk.f32.vlgmr.msra.gmra.mrb[10].mxu1 %vm784_vm1, %v1631_v3 }
 0x707   : > { %v1440_v20 = vpop.xlane.xlu0 %1439 }
 0x708   : > { %v1442_v21 = vsub.f32 %v1434_v7, %v1440_v20 }
 0x70a   : > { %v1445_v22 = vmul.f32 1.442695, %v1442_v21 }
 0x70b   : > { %v1449_v26 = vpop.xlane.xlu0 %1448 }
 0x70c   : > { %2654 = vpow2.f32 %v1445_v22 }
 0x70d   : > { %2656 = vrcp.f32 %v1449_v26  ;;  %v1970_v26 = vld [vmem:[%s3043_s12 + $0x8] sm:$0xff] }
 0x716   : > { %v2655_v23 = vpop.eup %2654 }
 0x717   : > { %v1450_v24 = vsel %vm870_vm3, %v2655_v23, 0.0  ;;  %v2657_v41 = vpop.eup %2656 }
 0x718   : > { %1451 = vadd.xlane.f32.xlu0 %v1450_v24  ;;  %v1455_v47 = vmul.f32 %v2657_v41, %v2649_v9 }
 0x7a5   : > { %v1452_v28 = vpop.xlane.xlu0 %1451 }
 0x7a6   : > { %2658 = vrcp.f32 %v1452_v28  ;;  %v1971_v28 = vld [vmem:[%s3043_s12 + $0x10] sm:$0xff] }
 0x7a7   : > { %v2556_v30 = vpack.c.bf16 %v1972_v29, %v1971_v28 }
 0x7b0   : > { %v2659_v43 = vpop.eup %2658 }
 0x7b1   : > { %v1456_v49 = vmul.f32 %v2659_v43, %v2655_v23 }
 0x7b3   : > { %v2417_v31 = vpop.f32.mrb[2].mxu0 }
 0x7b4   : > { %v1170_v32 = vpop.f32.mrb[3].mxu0 }
 0x7b5   : > { %2420 = vmatprep.mubr.msk.f32.mxu0 %vm784_vm1, %v1170_v32  ;;  %v2064_v32 = vld [vmem:[%s3045_s14 + $0x8] sm:$0xff] }
 0x7b6   : > { %2421 = vmatmul.mubr.msk.f32.vlgmr.msra.gmra.mrb[4].mxu0 %vm784_vm1, %v2417_v31  ;;  %v2453_v34 = vpop.f32.mrb[10].mxu1  ;;  %v2063_v31 = vld [vmem:[%s3045_s14] sm:$0xff] }
 0x7b7   : > { %2424 = vmatpush3.msra.mxu0 %v974_v62  ;;  %2425 = vmatprep.mubr.msk.f32.mxu0 %vm784_vm1, %v2897_v37  ;;  %v1710_v35 = vpop.f32.mrb[11].mxu1  ;;  %v1720_v39 = vmul.f32 0.35355338, %v2453_v34  ;;  %v1969_v62 = vld [vmem:[%s3043_s12] sm:$0xff]  ;;  %v2560_v34 = vpack.c.bf16 %v2064_v32, %v2063_v31 }
 0x7b8   : > { %2539 = vmatprep.subr.bf16.mxu0 %v2538_v33  ;;  %v1719_v38 = vmul.f32 0.35355338, %v1710_v35  ;;  %v2552_v27 = vpack.c.bf16 %v1970_v26, %v1969_v62  ;;  %v2066_v35 = vld [vmem:[%s3045_s14 + $0x18] sm:$0xff] }
 0x7b9   : > { %v1724_v37 = vsel %vm870_vm3, %v1720_v39, -inf }
 0x7ba   : > { %v1721_v40 = vsel %vm870_vm3, %v1719_v38, -inf  ;;  %2553 = vmatprep.subr.bf16.mxu1 %v2552_v27 }
 0x7bb   : > { %1722 = vmax.xlane.f32.xlu0 %v1721_v40  ;;  %2555 = vmatpush3.bf16.msra.mxu1 %v2552_v27  ;;  %v2068_v40 = vld [vmem:[%s3045_s14 + $0x28] sm:$0xff] }
 0x7bc   : > { %2557 = vmatprep.subr.bf16.mxu1 %v2556_v30 }
 0x7be   : > { %2426 = vmatmul.mubr.msk.f32.vlgmr.msra.gmra.mrb[4].mxu0 %vm784_vm1, %v2895_v36 }
 0x7bf   : > { %2541 = vmatpush3.bf16.msra.mxu0 %v2538_v33  ;;  %1725 = vmax.xlane.f32.xlu0 %v1724_v37  ;;  %v2065_v33 = vld [vmem:[%s3045_s14 + $0x10] sm:$0xff] }
 0x7c0   : > { %2439 = vmatprep.mubr.msk.f32.mxu0 %vm870_vm3, %v1455_v47  ;;  %2442 = vmatprep.subr.mxu0 %v1544_v44 }
 0x7c1   : > { %2559 = vmatpush3.bf16.msra.mxu1 %v2556_v30 }
 0x7c2   : > { %2440 = vmatmul.mubr.msk.f32.vlgmr.msra.gmra.mrb[6].mxu0 %vm870_vm3, %v1456_v49  ;;  %v2283_v49 = vld [vmem:[%s3041_s10] ss:$0 sm:$0xff] }
 0x7c3   : > { %2443 = vmatpush3.msra.mxu0 %v1544_v44 }
 0x7c4   : > { %2549 = vmatprep.subr.bf16.mxu0 %v2548_v52 }
 0x848   : > { %v1723_v53 = vpop.xlane.xlu0 %1722 }
 0x849   : > { %v1727_v54 = vsub.f32 %v1719_v38, %v1723_v53  ;;  %v2564_v38 = vpack.c.bf16 %v2066_v35, %v2065_v33  ;;  %v2284_v53 = vld [vmem:[%s3042_s11] ss:$0 sm:$0xff] }
 0x84b   : > { %v1729_v55 = vmul.f32 1.442695, %v1727_v54 }
 0x84c   : > { %v1726_v56 = vpop.xlane.xlu0 %1725 }
 0x84d   : > { %2660 = vpow2.f32 %v1729_v55  ;;  %v1728_v36 = vsub.f32 %v1720_v39, %v1726_v56  ;;  %v2067_v39 = vld [vmem:[%s3045_s14 + $0x20] sm:$0xff] }
 0x84e   : > { %v2568_v41 = vpack.c.bf16 %v2068_v40, %v2067_v39 }
 0x84f   : > { %v1731_v57 = vmul.f32 1.442695, %v1728_v36 }
 0x851   : > { %2662 = vpow2.f32 %v1731_v57 }
 0x857   : > { %v2661_v50 = vpop.eup %2660 }
 0x858   : > { %v1733_v59 = vsel %vm870_vm3, %v2661_v50, 0.0 }
 0x859   : > { %1734 = vadd.xlane.f32.xlu0 %v1733_v59  ;;  %v2069_v59 = vld [vmem:[%s3045_s14 + $0x30] sm:$0xff] }
 0x85b   : > { %v2663_v48 = vpop.eup %2662 }
 0x85c   : > { %v1736_v60 = vsel %vm870_vm3, %v2663_v48, 0.0 }
 0x85d   : > { %1737 = vadd.xlane.f32.xlu0 %v1736_v60 }
 0x895   : > { %v2441_v61 = vpop.f32.mrb[6].mxu0 }
 0x896   : > { %v1535_v58 = vpop.f32.mrb[7].mxu0 }
 0x897   : > { %2444 = vmatprep.mubr.msk.f32.mxu0 %vm784_vm1, %v1535_v58 }
 0x898   : > { %2445 = vmatmul.mubr.msk.f32.vlgmr.msra.gmra.mrb[4].mxu0 %vm784_vm1, %v2441_v61  ;;  %v2285_v61 = vld [vmem:[%s3044_s13] ss:$0 sm:$0xff] }
 0x899   : > { %2551 = vmatpush3.bf16.msra.mxu0 %v2548_v52 }
 0x89a   : > { %2461 = vmatprep.subr.mxu0 %v1830_v63 }
 0x8e6   : > { %v1735_v2 = vpop.xlane.xlu0 %1734 }
 0x8e7   : > { %2664 = vrcp.f32 %v1735_v2 }
 0x8ea   : > { %v1738_v3 = vpop.xlane.xlu0 %1737 }
 0x8eb   : > { %2666 = vrcp.f32 %v1738_v3 }
 0x8f1   : > { %v2665_v4 = vpop.eup %2664 }
 0x8f2   : > { %v1741_v5 = vmul.f32 %v2665_v4, %v2661_v50 }
 0x8f4   : > { %2458 = vmatprep.mubr.msk.f32.mxu0 %vm870_vm3, %v1741_v5 }
 0x8f5   : > { %v2667_v6 = vpop.eup %2666 }
 0x8f6   : > { %v1742_v7 = vmul.f32 %v2667_v6, %v2663_v48  ;;  %v2070_v48 = vld [vmem:[%s3045_s14 + $0x38] sm:$0xff]  ;;  %v2288_v6 = vld [vmem:[%s3046_s15] ss:$0 sm:$0xff] }
 0x8f7   : > { %v2572_v60 = vpack.c.bf16 %v2070_v48, %v2069_v59 }
 0x8f8   : > { %2459 = vmatmul.mubr.msk.f32.vlgmr.msra.gmra.mrb[8].mxu0 %vm870_vm3, %v1742_v7 }
 0x8f9   : > { %2462 = vmatpush3.msra.mxu0 %v1830_v63 }
 0x8fa   : > { %2561 = vmatprep.subr.bf16.mxu0 %v2560_v34 }
 0x9cb   : > { %v2460_v8 = vpop.f32.mrb[8].mxu0 }
 0x9cc   : > { %v1821_v9 = vpop.f32.mrb[9].mxu0 }
 0x9cd   : > { %2463 = vmatprep.mubr.msk.f32.mxu0 %vm784_vm1, %v1821_v9 }
 0x9ce   : > { %2464 = vmatmul.mubr.msk.f32.vlgmr.msra.gmra.mrb[4].mxu0 %vm784_vm1, %v2460_v8 }
 0x9cf   : > { %2563 = vmatpush3.bf16.msra.mxu0 %v2560_v34 }
 0x9d0   : > { %2565 = vmatprep.subr.bf16.mxu0 %v2564_v38 }
 0x9d3   : > { %2567 = vmatpush3.bf16.msra.mxu0 %v2564_v38 }
 0x9d4   : > { %2569 = vmatprep.subr.bf16.mxu0 %v2568_v41 }
 0x9d7   : > { %2571 = vmatpush3.bf16.msra.mxu0 %v2568_v41 }
 0x9d8   : > { %2573 = vmatprep.subr.bf16.mxu0 %v2572_v60 }
 0x9db   : > { %2575 = vmatpush3.bf16.msra.mxu0 %v2572_v60 }
 0xaa1   : > { %v2465_v10 = vpop.f32.mrb[4].mxu0 }
 0xaa2   : > { %v1915_v12 = vadd.f32 %v2465_v10, %v2788_v1  ;;  %v1903_v13 = vpop.f32.mrb[5].mxu0 }
 0xaa3   : > { %v1914_v14 = vadd.f32 %v1903_v13, %v2786_v0 }
 0xaa4   : > { %v2958_v51 = vadd.f32 %v2282_v11, %v1915_v12 }
 0xaa5   : > { %v2960_v15 = vadd.f32 %v2282_v11, %v1914_v14 }
 0xaa6   : > { %v1930_v16 = vsel %vm548_vm0, %v2958_v51, 0.0 }
 0xaa7   : > { %1931 = vadd.xlane.f32.xlu1 %v1930_v16  ;;  %v1927_v17 = vsel %vm548_vm0, %v2960_v15, 0.0 }
 0xaa8   : > { %1928 = vadd.xlane.f32.xlu0 %v1927_v17 }
 0xb34   : > { %v1932_v18 = vpop.xlane.xlu1 %1931 }
 0xb35   : > { %v1934_v19 = vmul.f32 0.03125, %v1932_v18  ;;  %v1929_v20 = vpop.xlane.xlu0 %1928 }
 0xb36   : > { %v1933_v21 = vmul.f32 0.03125, %v1929_v20 }
 0xb37   : > { %v1936_v1 = vsub.f32 %v2958_v51, %v1934_v19 }
 0xb38   : > { %v1935_v0 = vsub.f32 %v2960_v15, %v1933_v21 }
 0xb39   : > { %v1938_v24 = vmul.f32 %v1936_v1, %v1936_v1 }
 0xb3a   : > { %v1937_v22 = vmul.f32 %v1935_v0, %v1935_v0 }
 0xb3b   : > { %v1942_v25 = vsel %vm548_vm0, %v1938_v24, 0.0 }
 0xb3c   : > { %v1939_v23 = vsel %vm548_vm0, %v1937_v22, 0.0 }
 0xb3d   : > { %1940 = vadd.xlane.f32.xlu0 %v1939_v23 }
 0xb41   : > { %1943 = vadd.xlane.f32.xlu0 %v1942_v25 }
 0xbca   : > { %v1941_v42 = vpop.xlane.xlu0 %1940 }
 0xbcb   : > { %v1945_v43 = vmul.f32 0.03125, %v1941_v42 }
 0xbcd   : > { %v1947_v44 = vadd.f32 1e-05, %v1945_v43 }
 0xbce   : > { %v1944_v45 = vpop.xlane.xlu0 %1943 }
 0xbcf   : > { %2668 = vrsqrt.f32 %v1947_v44  ;;  %v1946_v46 = vmul.f32 0.03125, %v1944_v45 }
 0xbd1   : > { %v1948_v37 = vadd.f32 1e-05, %v1946_v46 }
 0xbd3   : > { %2670 = vrsqrt.f32 %v1948_v37 }
 0xbd9   : > { %v2669_v47 = vpop.eup %2668 }
 0xbda   : > { %v1951_v52 = vmul.f32 %v2669_v47, %v1935_v0 }
 0xbdc   : > { %v1959_v54 = vmul.f32 %v2283_v49, %v1951_v52 }
 0xbdd   : > { %v2671_v55 = vpop.eup %2670 }
 0xbde   : > { %v1952_v56 = vmul.f32 %v2671_v55, %v1936_v1  ;;  %v1967_v36 = vadd.f32 %v2284_v53, %v1959_v54 }
 0xbe0   : > { %v1960_v57 = vmul.f32 %v2283_v49, %v1952_v56  ;;  %2474 = vmatprep.mubr.msk.f32.mxu1 %vm548_vm0, %v1967_v36 }
 0xbe2   : > { %v1968_v50 = vadd.f32 %v2284_v53, %v1960_v57 }
 0xbe4   : > { %2475 = vmatmul.mubr.msk.f32.vlgmr.msra.gmra.mrb[12].mxu1 %vm548_vm0, %v1968_v50 }
 0xcb7   : > { %v2476_v58 = vpop.f32.mrb[12].mxu1 }
 0xcb8   : > { %v2058_v63 = vadd.f32 %v2476_v58, %v2285_v61  ;;  %v2052_v2 = vpop.f32.mrb[13].mxu1 }
 0xcb9   : > { %v2053_v3 = vadd.f32 %v2285_v61, %v2052_v2 }
 0xcba   : > { %v2062_v5 = vmax.f32 %v2058_v63, 0.0 }
 0xcbb   : > { %v2061_v4 = vmax.f32 %v2053_v3, 0.0 }
 0xcbd   : > { %2493 = vmatprep.mubr.msk.f32.mxu0 %vm2078_vm4, %v2061_v4 }
 0xcbe   : > { %2494 = vmatmul.mubr.msk.f32.vlgmr.msra.gmra.mrb[10].mxu0 %vm2078_vm4, %v2062_v5 }
 0xd91   : > { %v2495_v7 = vpop.f32.mrb[10].mxu0 }
 0xd92   : > { %v2157_v8 = vadd.f32 %v2495_v7, %v2288_v6  ;;  %v2151_v9 = vpop.f32.mrb[11].mxu0 }
 0xd93   : > { %v2152_v10 = vadd.f32 %v2288_v6, %v2151_v9 }
 0xd94   : > { %v2161_v11 = vadd.f32 %v2157_v8, %v2958_v51 }
 0xd95   : > { %v2160_v12 = vadd.f32 %v2152_v10, %v2960_v15 }
 0xd96   : > { %2163 = vst.msk [vmem:[%s541_s28 + $0x8] sm:$0xff] %vm548_vm0, %v2161_v11 }
 0xd97   : > { %2162 = vst.msk [vmem:[%s541_s28] sm:$0xff] %vm548_vm0, %v2160_v12 }
 0xd98 PF: > { %s26_s21 = sadd.s32 1, %s2678_s21  }
 0xd99   : > { %p23_p4 = scmp.ge.s32.totalorder %s26_s21, 4  }
 0xd9b   :  { %25 = sbr.rel (!%p23_p4) target bundleno = 2 (0x2), region = 117 }

</bundles_post_ra>
